<compile_context>
chip_gen: v7x
topology: tpu7x:2x2x1
jax: 0.10.0
libtpu: 0.0.40
codegen_flags: <defaults>
</compile_context>

<pallas_src>
import functools
import math

import jax
import jax.numpy as jnp
from jax.experimental import pallas as pl
from jax.experimental.pallas import tpu as pltpu

_LN_EPS = 1e-5  # PyTorch nn.LayerNorm default


def _layernorm(x, gamma, beta):
    mu = jnp.mean(x, axis=-1, keepdims=True)
    xc = x - mu
    var = jnp.mean(xc * xc, axis=-1, keepdims=True)
    return xc * jax.lax.rsqrt(var + _LN_EPS) * gamma + beta


def _gelu_tanh(x):
    # TODO(synk): nn.GELU() default is erf-based; tanh approximation used here
    # (max abs dev ~3e-3) to stay on the Mosaic EUP tanh path.
    c = math.sqrt(2.0 / math.pi)
    return 0.5 * x * (1.0 + jnp.tanh(c * (x + 0.044715 * x * x * x)))


def _transformer_kernel(x_ref, ln_ref, wqkv_ref, wout_ref, bout_ref,
                        w1_ref, b1_ref, w2_ref, b2_ref,
                        o_ref, res_ref, *, heads, dim_head):
    """One transformer layer for one batch element; grid = (batch, depth).

    x_ref    : (1, N, D)       fp32   (resident across the depth axis)
    ln_ref   : (1, 4, D)       fp32   rows = [ln1_g, ln1_b, ln2_g, ln2_b]
    wqkv_ref : (1, D, 3*H*Dh)  bf16   cols = q|k|v (head-major inside); W_q pre-scaled
    wout_ref : (1, H*Dh, D)    bf16
    bout_ref : (1, 1, D)       fp32
    w1_ref   : (1, D, mlp)     bf16,  b1_ref: (1, 1, mlp) fp32
    w2_ref   : (1, mlp, D)     bf16,  b2_ref: (1, 1, D)   fp32
    o_ref    : (1, N, D)       output (resident across depth; written at last layer)
    res_ref  : (N, D) fp32 VMEM scratch — residual stream, lives across layers
    """
    layer = pl.program_id(1)
    inner = heads * dim_head

    @pl.when(layer == 0)
    def _():
        res_ref[...] = x_ref[0].astype(jnp.float32)

    x = res_ref[...]                     # (N, D) fp32 residual stream
    ln = ln_ref[0]                       # (4, D) fp32

    # ---------------- PreNorm + Attention ----------------
    h1 = _layernorm(x, ln[0:1, :], ln[1:2, :]).astype(jnp.bfloat16)
    # Single wide QKV projection; q/k/v blocks at 128-aligned lane offsets.
    qkv = jnp.dot(h1, wqkv_ref[0], preferred_element_type=jnp.float32)   # (N, 3*inner)

    def split_heads(t):                  # (N, inner) fp32 -> (heads, N, dim_head) bf16
        return jnp.stack(
            [t[:, h * dim_head:(h + 1) * dim_head] for h in range(heads)], axis=0
        ).astype(jnp.bfloat16)

    q = split_heads(qkv[:, :inner])              # softmax scale folded into W_q
    k = split_heads(qkv[:, inner:2 * inner])
    v = split_heads(qkv[:, 2 * inner:])

    # TODO(synk): flash-style online softmax with a KV-tile grid axis for real N.
    s = jnp.einsum("hnd,hmd->hnm", q, k, preferred_element_type=jnp.float32)
    s = s - jnp.max(s, axis=-1, keepdims=True)
    e = jnp.exp(s)
    p = e * pl.reciprocal(jnp.sum(e, axis=-1, keepdims=True), approx=True)

    ctx = jnp.einsum("hnm,hmd->hnd", p.astype(jnp.bfloat16), v,
                     preferred_element_type=jnp.float32)                 # (H, N, Dh)
    # Head-major -> row-major relayout (lane concat, XLU slot), then one K=inner matmul.
    ctx = jnp.concatenate([ctx[h] for h in range(heads)], axis=-1)       # (N, inner)
    attn_out = jnp.dot(ctx.astype(jnp.bfloat16), wout_ref[0],
                       preferred_element_type=jnp.float32) + bout_ref[0]
    x = x + attn_out                     # residual 1

    # ---------------- PreNorm + FeedForward ----------------
    h2 = _layernorm(x, ln[2:3, :], ln[3:4, :]).astype(jnp.bfloat16)
    f = jnp.dot(h2, w1_ref[0], preferred_element_type=jnp.float32) + b1_ref[0]
    f = _gelu_tanh(f).astype(jnp.bfloat16)
    f = jnp.dot(f, w2_ref[0], preferred_element_type=jnp.float32) + b2_ref[0]
    x = x + f                            # residual 2

    res_ref[...] = x                     # carry residual to next layer (VMEM-resident)

    @pl.when(layer == pl.num_programs(1) - 1)
    def _():
        o_ref[0] = x.astype(o_ref.dtype)


def _build_transformer_call(B, N, D, depth, heads, dim_head, mlp_dim, x_dtype):
    inner = heads * dim_head
    kernel = functools.partial(_transformer_kernel, heads=heads, dim_head=dim_head)

    def per_layer(*shape):               # weight blocks: indexed by the depth axis only
        zeros = (0,) * len(shape)
        return pl.BlockSpec((1,) + shape, lambda b, l: (l,) + zeros)

    grid_spec = pltpu.PrefetchScalarGridSpec(
        num_scalar_prefetch=0,
        grid=(B, depth),                 # batch outer (parallel), depth inner (arbitrary)
        in_specs=[
            pl.BlockSpec((1, N, D), lambda b, l: (b, 0, 0)),  # x (resident across depth)
            per_layer(4, D),             # LayerNorm params
            per_layer(D, 3 * inner),     # fused QKV weights
            per_layer(inner, D),         # output-projection weights
            per_layer(1, D),             # output-projection bias
            per_layer(D, mlp_dim),       # FF w1
            per_layer(1, mlp_dim),       # FF b1
            per_layer(mlp_dim, D),       # FF w2
            per_layer(1, D),             # FF b2
        ],
        out_specs=pl.BlockSpec((1, N, D), lambda b, l: (b, 0, 0)),
        scratch_shapes=[pltpu.VMEM((N, D), jnp.float32)],     # residual stream
    )

    flops = depth * B * (2 * N * D * 3 * inner            # qkv projection
                         + 4 * heads * N * N * dim_head   # scores + attn @ v
                         + 2 * N * inner * D              # output projection
                         + 4 * N * D * mlp_dim)           # feed-forward
    transcendentals = depth * B * (heads * N * N + N * mlp_dim)
    weight_bytes = 2 * (D * 3 * inner + inner * D + 2 * D * mlp_dim)
    bytes_accessed = (2 * 4 * B * N * D                    # x in + out
                      + B * depth * weight_bytes           # weights streamed per batch block
                      + 4 * B * depth * (6 * D + mlp_dim))

    return pl.pallas_call(
        kernel,
        out_shape=jax.ShapeDtypeStruct((B, N, D), x_dtype),
        grid_spec=grid_spec,
        compiler_params=pltpu.CompilerParams(
            dimension_semantics=("parallel", "arbitrary"),
            # Small demo footprint; at real ViT dims keep this <= ~56 MiB on v7x
            # (64 MiB physical VMEM) and consider deeper buffering on v6e.
            vmem_limit_bytes=32 * 1024 * 1024,
        ),
        cost_estimate=pl.CostEstimate(flops=int(flops),
                                      transcendentals=int(transcendentals),
                                      bytes_accessed=int(bytes_accessed)),
    )


def transformer_forward(x, packed, *, heads, dim_head):
    """x: (B, N, D) fp32; packed: dict of depth-stacked, pre-packed parameters."""
    B, N, D = x.shape
    depth = packed["ln"].shape[0]
    mlp_dim = packed["w1"].shape[-1]
    call = _build_transformer_call(B, N, D, depth, heads, dim_head, mlp_dim, x.dtype)
    return call(x, packed["ln"], packed["wqkv"], packed["wout"], packed["bout"],
                packed["w1"], packed["b1"], packed["w2"], packed["b2"])


# ----------------------- parameter init / packing -----------------------

def init_layer_params(key, dim, heads, dim_head, mlp_dim):
    """PyTorch-layout parameters for one layer (Linear weight = (out, in))."""
    inner = heads * dim_head
    k = jax.random.split(key, 11)
    nrm = lambda kk, shape, s: jax.random.normal(kk, shape, jnp.float32) * s
    return {
        "ln1_g": 1.0 + 0.1 * jax.random.normal(k[0], (dim,), jnp.float32),
        "ln1_b": 0.1 * jax.random.normal(k[1], (dim,), jnp.float32),
        "w_qkv": nrm(k[2], (3 * inner, dim), dim ** -0.5),        # to_qkv (no bias)
        "w_out": nrm(k[3], (dim, inner), inner ** -0.5),          # to_out[0]
        "b_out": 0.1 * jax.random.normal(k[4], (dim,), jnp.float32),
        "ln2_g": 1.0 + 0.1 * jax.random.normal(k[5], (dim,), jnp.float32),
        "ln2_b": 0.1 * jax.random.normal(k[6], (dim,), jnp.float32),
        "w1": nrm(k[7], (mlp_dim, dim), dim ** -0.5),
        "b1": 0.1 * jax.random.normal(k[8], (mlp_dim,), jnp.float32),
        "w2": nrm(k[9], (dim, mlp_dim), mlp_dim ** -0.5),
        "b2": 0.1 * jax.random.normal(k[10], (dim,), jnp.float32),
    }


def pack_transformer_params(raw_layers, heads, dim_head):
    """One-time repack: depth-stacked, transposed, bf16, scale folded into W_q."""
    dim = raw_layers[0]["ln1_g"].shape[0]
    inner = heads * dim_head
    scale = dim_head ** -0.5
    row_scale = jnp.concatenate([jnp.full((inner,), scale, jnp.float32),
                                 jnp.ones((2 * inner,), jnp.float32)])[:, None]
    ln, wqkv, wout, bout, w1, b1, w2, b2 = ([] for _ in range(8))
    for p in raw_layers:
        ln.append(jnp.stack([p["ln1_g"], p["ln1_b"], p["ln2_g"], p["ln2_b"]]))
        wqkv.append((p["w_qkv"] * row_scale).T)    # (dim, 3*inner): cols q|k|v, head-major within
        wout.append(p["w_out"].T)                  # (inner, dim), rows head-major
        bout.append(p["b_out"].reshape(1, dim))
        w1.append(p["w1"].T)                       # (dim, mlp)
        b1.append(p["b1"].reshape(1, -1))
        w2.append(p["w2"].T)                       # (mlp, dim)
        b2.append(p["b2"].reshape(1, dim))
    f32 = lambda xs: jnp.stack(xs).astype(jnp.float32)
    bf16 = lambda xs: jnp.stack(xs).astype(jnp.bfloat16)
    return {"ln": f32(ln), "wqkv": bf16(wqkv), "wout": bf16(wout), "bout": f32(bout),
            "w1": bf16(w1), "b1": f32(b1), "w2": bf16(w2), "b2": f32(b2)}


# ----------------------- pure-JAX fp32 reference -----------------------

def transformer_reference(x, layers, *, heads, dim_head):
    scale = dim_head ** -0.5
    B, N, D = x.shape

    def ln(t, g, b):
        mu = t.mean(-1, keepdims=True)
        var = ((t - mu) ** 2).mean(-1, keepdims=True)
        return (t - mu) / jnp.sqrt(var + _LN_EPS) * g + b

    for p in layers:
        h = ln(x, p["ln1_g"], p["ln1_b"])
        qkv = h @ p["w_qkv"].T
        q, k, v = jnp.split(qkv, 3, axis=-1)
        to_heads = lambda t: t.reshape(B, N, heads, dim_head).transpose(0, 2, 1, 3)
        q, k, v = map(to_heads, (q, k, v))
        dots = jnp.einsum("bhnd,bhmd->bhnm", q, k) * scale
        attn = jax.nn.softmax(dots, axis=-1)
        out = jnp.einsum("bhnm,bhmd->bhnd", attn, v)
        out = out.transpose(0, 2, 1, 3).reshape(B, N, heads * dim_head)
        x = out @ p["w_out"].T + p["b_out"] + x
        h2 = ln(x, p["ln2_g"], p["ln2_b"])
        f = jax.nn.gelu(h2 @ p["w1"].T + p["b1"], approximate=False)  # nn.GELU (erf)
        x = f @ p["w2"].T + p["b2"] + x
    return x


if __name__ == "__main__":
    # Small shapes, but TPU-friendly: dim multiple of 128 (lane-dense stores),
    # N multiple of 8 (sublane), batch grid axis of 2 "parallel" steps.
    B, N = 2, 16
    dim, depth, heads, dim_head, mlp_dim = 128, 2, 4, 64, 256

    key = jax.random.PRNGKey(0)
    kx, kp = jax.random.split(key)
    x = jax.random.normal(kx, (B, N, dim), dtype=jnp.float32)

    layer_keys = jax.random.split(kp, depth)
    raw_layers = [init_layer_params(k, dim, heads, dim_head, mlp_dim) for k in layer_keys]
    # One-time weight packing (transpose / bf16 cast / scale fold / depth stacking).
    packed = pack_transformer_params(raw_layers, heads, dim_head)

    fwd = jax.jit(functools.partial(transformer_forward, heads=heads, dim_head=dim_head))
    y = jax.block_until_ready(fwd(x, packed))

    y_ref = transformer_reference(x, raw_layers, heads=heads, dim_head=dim_head)
    assert y.shape == (B, N, dim)
    rel_err = jnp.sqrt(jnp.sum((y.astype(jnp.float32) - y_ref) ** 2) / jnp.sum(y_ref ** 2))
    assert bool(jnp.isfinite(rel_err)) and float(rel_err) < 2e-2, (
        f"Pallas output mismatch vs reference: rel_err={float(rel_err)}")

    print("KERNEL_OK")
</pallas_src>

<mosaic_0001>
module attributes {stable_mosaic.version = 11 : i64} {
  func.func @_transformer_kernel(%arg0: i32, %arg1: i32, %arg2: memref<1x16x128xf32, #tpu.memory_space<vmem>>, %arg3: memref<1x4x128xf32, #tpu.memory_space<vmem>>, %arg4: memref<1x128x768xbf16, #tpu.memory_space<vmem>>, %arg5: memref<1x256x128xbf16, #tpu.memory_space<vmem>>, %arg6: memref<1x1x128xf32, #tpu.memory_space<vmem>>, %arg7: memref<1x128x256xbf16, #tpu.memory_space<vmem>>, %arg8: memref<1x1x256xf32, #tpu.memory_space<vmem>>, %arg9: memref<1x256x128xbf16, #tpu.memory_space<vmem>>, %arg10: memref<1x1x128xf32, #tpu.memory_space<vmem>>, %arg11: memref<1x16x128xf32, #tpu.memory_space<vmem>>, %arg12: memref<16x128xf32, #tpu.memory_space<vmem>>) attributes {dimension_semantics = [#tpu.dimension_semantics<parallel>, #tpu.dimension_semantics<arbitrary>], iteration_bounds = array<i64: 2, 2>, scalar_prefetch = 0 : i64, scratch_operands = 1 : i64, tpu.core_type = #tpu.core_type<tc>, window_params = [{transform_indices = @transform_0, window_bounds = array<i64: 1, 16, 128>}, {transform_indices = @transform_1, window_bounds = array<i64: 1, 4, 128>}, {transform_indices = @transform_2, window_bounds = array<i64: 1, 128, 768>}, {transform_indices = @transform_3, window_bounds = array<i64: 1, 256, 128>}, {transform_indices = @transform_4, window_bounds = array<i64: 1, 1, 128>}, {transform_indices = @transform_5, window_bounds = array<i64: 1, 128, 256>}, {transform_indices = @transform_6, window_bounds = array<i64: 1, 1, 256>}, {transform_indices = @transform_7, window_bounds = array<i64: 1, 256, 128>}, {transform_indices = @transform_8, window_bounds = array<i64: 1, 1, 128>}, {transform_indices = @transform_9, window_bounds = array<i64: 1, 16, 128>}]} {
    %c0_i32 = arith.constant 0 : i32
    %0 = arith.cmpi eq, %arg1, %c0_i32 : i32
    %1 = arith.extui %0 : i1 to i32
    %c0_i32_0 = arith.constant 0 : i32
    %2 = arith.cmpi ne, %1, %c0_i32_0 : i32
    scf.if %2 {
      %c0_50 = arith.constant 0 : index
      %c0_51 = arith.constant 0 : index
      %c0_52 = arith.constant 0 : index
      %152 = vector.load %arg2[%c0_50, %c0_51, %c0_52] : memref<1x16x128xf32, #tpu.memory_space<vmem>>, vector<1x16x128xf32>
      %153 = vector.shape_cast %152 : vector<1x16x128xf32> to vector<16x128xf32>
      %c0_53 = arith.constant 0 : index
      %c0_54 = arith.constant 0 : index
      %154 = vector.load %arg12[%c0_53, %c0_54] : memref<16x128xf32, #tpu.memory_space<vmem>>, vector<16x128xf32>
      tpu.vector_store %arg12[%c0_53, %c0_54], %153 {strides = array<i32>} : memref<16x128xf32, #tpu.memory_space<vmem>>, vector<16x128xf32>,
    } else {
    }
    %c0 = arith.constant 0 : index
    %c0_1 = arith.constant 0 : index
    %3 = vector.load %arg12[%c0, %c0_1] : memref<16x128xf32, #tpu.memory_space<vmem>>, vector<16x128xf32>
    %c0_2 = arith.constant 0 : index
    %c0_3 = arith.constant 0 : index
    %c0_4 = arith.constant 0 : index
    %4 = vector.load %arg3[%c0_2, %c0_3, %c0_4] : memref<1x4x128xf32, #tpu.memory_space<vmem>>, vector<1x4x128xf32>
    %5 = vector.shape_cast %4 : vector<1x4x128xf32> to vector<4x128xf32>
    %6 = vector.extract_strided_slice %5 {offsets = [0, 0], sizes = [1, 128], strides = [1, 1]} : vector<4x128xf32> to vector<1x128xf32>
    %7 = vector.extract_strided_slice %5 {offsets = [1, 0], sizes = [1, 128], strides = [1, 1]} : vector<4x128xf32> to vector<1x128xf32>
    %cst = arith.constant dense<0.000000e+00> : vector<16xf32>
    %8 = vector.multi_reduction <add>, %3, %cst [1] : vector<16x128xf32> to vector<16xf32>
    %9 = vector.shape_cast %8 : vector<16xf32> to vector<16x1xf32>
    %cst_5 = arith.constant 1.280000e+02 : f32
    %10 = vector.broadcast %cst_5 : f32 to vector<16x1xf32>
    %11 = arith.divf %9, %10 : vector<16x1xf32>
    %12 = vector.broadcast %11 : vector<16x1xf32> to vector<16x128xf32>
    %13 = arith.subf %3, %12 : vector<16x128xf32>
    %14 = arith.mulf %13, %13 : vector<16x128xf32>
    %cst_6 = arith.constant dense<0.000000e+00> : vector<16xf32>
    %15 = vector.multi_reduction <add>, %14, %cst_6 [1] : vector<16x128xf32> to vector<16xf32>
    %16 = vector.shape_cast %15 : vector<16xf32> to vector<16x1xf32>
    %cst_7 = arith.constant 1.280000e+02 : f32
    %17 = vector.broadcast %cst_7 : f32 to vector<16x1xf32>
    %18 = arith.divf %16, %17 : vector<16x1xf32>
    %cst_8 = arith.constant 9.99999974E-6 : f32
    %19 = vector.broadcast %cst_8 : f32 to vector<16x1xf32>
    %20 = arith.addf %18, %19 : vector<16x1xf32>
    %21 = math.rsqrt %20 : vector<16x1xf32>
    %22 = vector.broadcast %21 : vector<16x1xf32> to vector<16x128xf32>
    %23 = arith.mulf %13, %22 : vector<16x128xf32>
    %24 = vector.broadcast %6 : vector<1x128xf32> to vector<16x128xf32>
    %25 = arith.mulf %23, %24 : vector<16x128xf32>
    %26 = vector.broadcast %7 : vector<1x128xf32> to vector<16x128xf32>
    %27 = arith.addf %25, %26 : vector<16x128xf32>
    %28 = arith.truncf %27 : vector<16x128xf32> to vector<16x128xbf16>
    %c0_9 = arith.constant 0 : index
    %c0_10 = arith.constant 0 : index
    %c0_11 = arith.constant 0 : index
    %29 = vector.load %arg4[%c0_9, %c0_10, %c0_11] : memref<1x128x768xbf16, #tpu.memory_space<vmem>>, vector<1x128x768xbf16>
    %30 = vector.shape_cast %29 : vector<1x128x768xbf16> to vector<128x768xbf16>
    %cst_12 = arith.constant dense<0.000000e+00> : vector<16x768xf32>
    %31 = tpu.matmul %28, %30, %cst_12 {dimension_numbers = #tpu.dot_dimension_numbers<[1], [0], [0], [1], [0, 0, 1, 1], [], []>} : vector<16x128xbf16>, vector<128x768xbf16>, vector<16x768xf32> -> vector<16x768xf32>
    %32 = vector.extract_strided_slice %31 {offsets = [0, 0], sizes = [16, 256], strides = [1, 1]} : vector<16x768xf32> to vector<16x256xf32>
    %33 = vector.extract_strided_slice %32 {offsets = [0, 0], sizes = [16, 64], strides = [1, 1]} : vector<16x256xf32> to vector<16x64xf32>
    %34 = vector.extract_strided_slice %32 {offsets = [0, 64], sizes = [16, 64], strides = [1, 1]} : vector<16x256xf32> to vector<16x64xf32>
    %35 = vector.extract_strided_slice %32 {offsets = [0, 128], sizes = [16, 64], strides = [1, 1]} : vector<16x256xf32> to vector<16x64xf32>
    %36 = vector.extract_strided_slice %32 {offsets = [0, 192], sizes = [16, 64], strides = [1, 1]} : vector<16x256xf32> to vector<16x64xf32>
    %37 = vector.shape_cast %33 : vector<16x64xf32> to vector<1x16x64xf32>
    %38 = vector.shape_cast %34 : vector<16x64xf32> to vector<1x16x64xf32>
    %39 = vector.shape_cast %35 : vector<16x64xf32> to vector<1x16x64xf32>
    %40 = vector.shape_cast %36 : vector<16x64xf32> to vector<1x16x64xf32>
    %41 = tpu.concatenate %37, %38, %39, %40 in 0 : vector<1x16x64xf32>, vector<1x16x64xf32>, vector<1x16x64xf32>, vector<1x16x64xf32> -> vector<4x16x64xf32>
    %42 = arith.truncf %41 : vector<4x16x64xf32> to vector<4x16x64xbf16>
    %43 = vector.extract_strided_slice %31 {offsets = [0, 256], sizes = [16, 256], strides = [1, 1]} : vector<16x768xf32> to vector<16x256xf32>
    %44 = vector.extract_strided_slice %43 {offsets = [0, 0], sizes = [16, 64], strides = [1, 1]} : vector<16x256xf32> to vector<16x64xf32>
    %45 = vector.extract_strided_slice %43 {offsets = [0, 64], sizes = [16, 64], strides = [1, 1]} : vector<16x256xf32> to vector<16x64xf32>
    %46 = vector.extract_strided_slice %43 {offsets = [0, 128], sizes = [16, 64], strides = [1, 1]} : vector<16x256xf32> to vector<16x64xf32>
    %47 = vector.extract_strided_slice %43 {offsets = [0, 192], sizes = [16, 64], strides = [1, 1]} : vector<16x256xf32> to vector<16x64xf32>
    %48 = vector.shape_cast %44 : vector<16x64xf32> to vector<1x16x64xf32>
    %49 = vector.shape_cast %45 : vector<16x64xf32> to vector<1x16x64xf32>
    %50 = vector.shape_cast %46 : vector<16x64xf32> to vector<1x16x64xf32>
    %51 = vector.shape_cast %47 : vector<16x64xf32> to vector<1x16x64xf32>
    %52 = tpu.concatenate %48, %49, %50, %51 in 0 : vector<1x16x64xf32>, vector<1x16x64xf32>, vector<1x16x64xf32>, vector<1x16x64xf32> -> vector<4x16x64xf32>
    %53 = arith.truncf %52 : vector<4x16x64xf32> to vector<4x16x64xbf16>
    %54 = vector.extract_strided_slice %31 {offsets = [0, 512], sizes = [16, 256], strides = [1, 1]} : vector<16x768xf32> to vector<16x256xf32>
    %55 = vector.extract_strided_slice %54 {offsets = [0, 0], sizes = [16, 64], strides = [1, 1]} : vector<16x256xf32> to vector<16x64xf32>
    %56 = vector.extract_strided_slice %54 {offsets = [0, 64], sizes = [16, 64], strides = [1, 1]} : vector<16x256xf32> to vector<16x64xf32>
    %57 = vector.extract_strided_slice %54 {offsets = [0, 128], sizes = [16, 64], strides = [1, 1]} : vector<16x256xf32> to vector<16x64xf32>
    %58 = vector.extract_strided_slice %54 {offsets = [0, 192], sizes = [16, 64], strides = [1, 1]} : vector<16x256xf32> to vector<16x64xf32>
    %59 = vector.shape_cast %55 : vector<16x64xf32> to vector<1x16x64xf32>
    %60 = vector.shape_cast %56 : vector<16x64xf32> to vector<1x16x64xf32>
    %61 = vector.shape_cast %57 : vector<16x64xf32> to vector<1x16x64xf32>
    %62 = vector.shape_cast %58 : vector<16x64xf32> to vector<1x16x64xf32>
    %63 = tpu.concatenate %59, %60, %61, %62 in 0 : vector<1x16x64xf32>, vector<1x16x64xf32>, vector<1x16x64xf32>, vector<1x16x64xf32> -> vector<4x16x64xf32>
    %64 = arith.truncf %63 : vector<4x16x64xf32> to vector<4x16x64xbf16>
    "tpu.trace_start"() <{level = 10 : i32, message = "hnd,hmd->hnm"}> : () -> ()
    %cst_13 = arith.constant dense<0.000000e+00> : vector<4x16x16xf32>
    %65 = tpu.matmul %42, %53, %cst_13 {dimension_numbers = #tpu.dot_dimension_numbers<[2], [2], [1], [1], [0, 0, 0, 1, 1, 1], [0], [0]>} : vector<4x16x64xbf16>, vector<4x16x64xbf16>, vector<4x16x16xf32> -> vector<4x16x16xf32>
    "tpu.trace_stop"() : () -> ()
    %cst_14 = arith.constant dense<0xFF800000> : vector<4x16xf32>
    %66 = vector.multi_reduction <maximumf>, %65, %cst_14 [2] : vector<4x16x16xf32> to vector<4x16xf32>
    %67 = vector.shape_cast %66 : vector<4x16xf32> to vector<4x16x1xf32>
    %68 = vector.broadcast %67 : vector<4x16x1xf32> to vector<4x16x16xf32>
    %69 = arith.subf %65, %68 : vector<4x16x16xf32>
    %70 = math.exp %69 : vector<4x16x16xf32>
    %cst_15 = arith.constant dense<0.000000e+00> : vector<4x16xf32>
    %71 = vector.multi_reduction <add>, %70, %cst_15 [2] : vector<4x16x16xf32> to vector<4x16xf32>
    %72 = vector.shape_cast %71 : vector<4x16xf32> to vector<4x16x1xf32>
    %73 = tpu.reciprocal %72 {approx = true} : vector<4x16x1xf32> -> vector<4x16x1xf32>
    %74 = vector.broadcast %73 : vector<4x16x1xf32> to vector<4x16x16xf32>
    %75 = arith.mulf %70, %74 : vector<4x16x16xf32>
    %76 = arith.truncf %75 : vector<4x16x16xf32> to vector<4x16x16xbf16>
    "tpu.trace_start"() <{level = 10 : i32, message = "hnm,hmd->hnd"}> : () -> ()
    %cst_16 = arith.constant dense<0.000000e+00> : vector<4x16x64xf32>
    %77 = tpu.matmul %76, %64, %cst_16 {dimension_numbers = #tpu.dot_dimension_numbers<[2], [1], [1], [2], [0, 0, 0, 1, 1, 2], [0], [0]>} : vector<4x16x16xbf16>, vector<4x16x64xbf16>, vector<4x16x64xf32> -> vector<4x16x64xf32>
    "tpu.trace_stop"() : () -> ()
    %78 = vector.extract_strided_slice %77 {offsets = [0, 0, 0], sizes = [1, 16, 64], strides = [1, 1, 1]} : vector<4x16x64xf32> to vector<1x16x64xf32>
    %79 = vector.shape_cast %78 : vector<1x16x64xf32> to vector<16x64xf32>
    %80 = vector.extract_strided_slice %77 {offsets = [1, 0, 0], sizes = [1, 16, 64], strides = [1, 1, 1]} : vector<4x16x64xf32> to vector<1x16x64xf32>
    %81 = vector.shape_cast %80 : vector<1x16x64xf32> to vector<16x64xf32>
    %82 = vector.extract_strided_slice %77 {offsets = [2, 0, 0], sizes = [1, 16, 64], strides = [1, 1, 1]} : vector<4x16x64xf32> to vector<1x16x64xf32>
    %83 = vector.shape_cast %82 : vector<1x16x64xf32> to vector<16x64xf32>
    %84 = vector.extract_strided_slice %77 {offsets = [3, 0, 0], sizes = [1, 16, 64], strides = [1, 1, 1]} : vector<4x16x64xf32> to vector<1x16x64xf32>
    %85 = vector.shape_cast %84 : vector<1x16x64xf32> to vector<16x64xf32>
    %86 = tpu.concatenate %79, %81, %83, %85 in 1 : vector<16x64xf32>, vector<16x64xf32>, vector<16x64xf32>, vector<16x64xf32> -> vector<16x256xf32>
    %87 = arith.truncf %86 : vector<16x256xf32> to vector<16x256xbf16>
    %c0_17 = arith.constant 0 : index
    %c0_18 = arith.constant 0 : index
    %c0_19 = arith.constant 0 : index
    %88 = vector.load %arg5[%c0_17, %c0_18, %c0_19] : memref<1x256x128xbf16, #tpu.memory_space<vmem>>, vector<1x256x128xbf16>
    %89 = vector.shape_cast %88 : vector<1x256x128xbf16> to vector<256x128xbf16>
    %cst_20 = arith.constant dense<0.000000e+00> : vector<16x128xf32>
    %90 = tpu.matmul %87, %89, %cst_20 {dimension_numbers = #tpu.dot_dimension_numbers<[1], [0], [0], [1], [0, 0, 1, 1], [], []>} : vector<16x256xbf16>, vector<256x128xbf16>, vector<16x128xf32> -> vector<16x128xf32>
    %c0_21 = arith.constant 0 : index
    %c0_22 = arith.constant 0 : index
    %c0_23 = arith.constant 0 : index
    %91 = vector.load %arg6[%c0_21, %c0_22, %c0_23] : memref<1x1x128xf32, #tpu.memory_space<vmem>>, vector<1x1x128xf32>
    %92 = vector.shape_cast %91 : vector<1x1x128xf32> to vector<1x128xf32>
    %93 = vector.broadcast %92 : vector<1x128xf32> to vector<16x128xf32>
    %94 = arith.addf %90, %93 : vector<16x128xf32>
    %95 = arith.addf %3, %94 : vector<16x128xf32>
    %96 = vector.extract_strided_slice %5 {offsets = [2, 0], sizes = [1, 128], strides = [1, 1]} : vector<4x128xf32> to vector<1x128xf32>
    %97 = vector.extract_strided_slice %5 {offsets = [3, 0], sizes = [1, 128], strides = [1, 1]} : vector<4x128xf32> to vector<1x128xf32>
    %cst_24 = arith.constant dense<0.000000e+00> : vector<16xf32>
    %98 = vector.multi_reduction <add>, %95, %cst_24 [1] : vector<16x128xf32> to vector<16xf32>
    %99 = vector.shape_cast %98 : vector<16xf32> to vector<16x1xf32>
    %cst_25 = arith.constant 1.280000e+02 : f32
    %100 = vector.broadcast %cst_25 : f32 to vector<16x1xf32>
    %101 = arith.divf %99, %100 : vector<16x1xf32>
    %102 = vector.broadcast %101 : vector<16x1xf32> to vector<16x128xf32>
    %103 = arith.subf %95, %102 : vector<16x128xf32>
    %104 = arith.mulf %103, %103 : vector<16x128xf32>
    %cst_26 = arith.constant dense<0.000000e+00> : vector<16xf32>
    %105 = vector.multi_reduction <add>, %104, %cst_26 [1] : vector<16x128xf32> to vector<16xf32>
    %106 = vector.shape_cast %105 : vector<16xf32> to vector<16x1xf32>
    %cst_27 = arith.constant 1.280000e+02 : f32
    %107 = vector.broadcast %cst_27 : f32 to vector<16x1xf32>
    %108 = arith.divf %106, %107 : vector<16x1xf32>
    %cst_28 = arith.constant 9.99999974E-6 : f32
    %109 = vector.broadcast %cst_28 : f32 to vector<16x1xf32>
    %110 = arith.addf %108, %109 : vector<16x1xf32>
    %111 = math.rsqrt %110 : vector<16x1xf32>
    %112 = vector.broadcast %111 : vector<16x1xf32> to vector<16x128xf32>
    %113 = arith.mulf %103, %112 : vector<16x128xf32>
    %114 = vector.broadcast %96 : vector<1x128xf32> to vector<16x128xf32>
    %115 = arith.mulf %113, %114 : vector<16x128xf32>
    %116 = vector.broadcast %97 : vector<1x128xf32> to vector<16x128xf32>
    %117 = arith.addf %115, %116 : vector<16x128xf32>
    %118 = arith.truncf %117 : vector<16x128xf32> to vector<16x128xbf16>
    %c0_29 = arith.constant 0 : index
    %c0_30 = arith.constant 0 : index
    %c0_31 = arith.constant 0 : index
    %119 = vector.load %arg7[%c0_29, %c0_30, %c0_31] : memref<1x128x256xbf16, #tpu.memory_space<vmem>>, vector<1x128x256xbf16>
    %120 = vector.shape_cast %119 : vector<1x128x256xbf16> to vector<128x256xbf16>
    %cst_32 = arith.constant dense<0.000000e+00> : vector<16x256xf32>
    %121 = tpu.matmul %118, %120, %cst_32 {dimension_numbers = #tpu.dot_dimension_numbers<[1], [0], [0], [1], [0, 0, 1, 1], [], []>} : vector<16x128xbf16>, vector<128x256xbf16>, vector<16x256xf32> -> vector<16x256xf32>
    %c0_33 = arith.constant 0 : index
    %c0_34 = arith.constant 0 : index
    %c0_35 = arith.constant 0 : index
    %122 = vector.load %arg8[%c0_33, %c0_34, %c0_35] : memref<1x1x256xf32, #tpu.memory_space<vmem>>, vector<1x1x256xf32>
    %123 = vector.shape_cast %122 : vector<1x1x256xf32> to vector<1x256xf32>
    %124 = vector.broadcast %123 : vector<1x256xf32> to vector<16x256xf32>
    %125 = arith.addf %121, %124 : vector<16x256xf32>
    %cst_36 = arith.constant 5.000000e-01 : f32
    %126 = vector.broadcast %cst_36 : f32 to vector<16x256xf32>
    %127 = arith.mulf %126, %125 : vector<16x256xf32>
    %cst_37 = arith.constant 4.471500e-02 : f32
    %128 = vector.broadcast %cst_37 : f32 to vector<16x256xf32>
    %129 = arith.mulf %128, %125 : vector<16x256xf32>
    %130 = arith.mulf %129, %125 : vector<16x256xf32>
    %131 = arith.mulf %130, %125 : vector<16x256xf32>
    %132 = arith.addf %125, %131 : vector<16x256xf32>
    %cst_38 = arith.constant 0.797884583 : f32
    %133 = vector.broadcast %cst_38 : f32 to vector<16x256xf32>
    %134 = arith.mulf %133, %132 : vector<16x256xf32>
    %135 = math.tanh %134 : vector<16x256xf32>
    %cst_39 = arith.constant 1.000000e+00 : f32
    %136 = vector.broadcast %cst_39 : f32 to vector<16x256xf32>
    %137 = arith.addf %136, %135 : vector<16x256xf32>
    %138 = arith.mulf %127, %137 : vector<16x256xf32>
    %139 = arith.truncf %138 : vector<16x256xf32> to vector<16x256xbf16>
    %c0_40 = arith.constant 0 : index
    %c0_41 = arith.constant 0 : index
    %c0_42 = arith.constant 0 : index
    %140 = vector.load %arg9[%c0_40, %c0_41, %c0_42] : memref<1x256x128xbf16, #tpu.memory_space<vmem>>, vector<1x256x128xbf16>
    %141 = vector.shape_cast %140 : vector<1x256x128xbf16> to vector<256x128xbf16>
    %cst_43 = arith.constant dense<0.000000e+00> : vector<16x128xf32>
    %142 = tpu.matmul %139, %141, %cst_43 {dimension_numbers = #tpu.dot_dimension_numbers<[1], [0], [0], [1], [0, 0, 1, 1], [], []>} : vector<16x256xbf16>, vector<256x128xbf16>, vector<16x128xf32> -> vector<16x128xf32>
    %c0_44 = arith.constant 0 : index
    %c0_45 = arith.constant 0 : index
    %c0_46 = arith.constant 0 : index
    %143 = vector.load %arg10[%c0_44, %c0_45, %c0_46] : memref<1x1x128xf32, #tpu.memory_space<vmem>>, vector<1x1x128xf32>
    %144 = vector.shape_cast %143 : vector<1x1x128xf32> to vector<1x128xf32>
    %145 = vector.broadcast %144 : vector<1x128xf32> to vector<16x128xf32>
    %146 = arith.addf %142, %145 : vector<16x128xf32>
    %147 = arith.addf %95, %146 : vector<16x128xf32>
    %c0_47 = arith.constant 0 : index
    %c0_48 = arith.constant 0 : index
    %148 = vector.load %arg12[%c0_47, %c0_48] : memref<16x128xf32, #tpu.memory_space<vmem>>, vector<16x128xf32>
    tpu.vector_store %arg12[%c0_47, %c0_48], %147 {strides = array<i32>} : memref<16x128xf32, #tpu.memory_space<vmem>>, vector<16x128xf32>,
    %c1_i32 = arith.constant 1 : i32
    %149 = arith.cmpi eq, %arg1, %c1_i32 : i32
    %150 = arith.extui %149 : i1 to i32
    %c0_i32_49 = arith.constant 0 : i32
    %151 = arith.cmpi ne, %150, %c0_i32_49 : i32
    scf.if %151 {
      %c0_50 = arith.constant 0 : index
      %c0_51 = arith.constant 0 : index
      %c0_52 = arith.constant 0 : index
      %152 = vector.load %arg11[%c0_50, %c0_51, %c0_52] : memref<1x16x128xf32, #tpu.memory_space<vmem>>, vector<1x16x128xf32>
      %153 = vector.shape_cast %152 : vector<1x16x128xf32> to vector<16x128xf32>
      %154 = vector.shape_cast %147 : vector<16x128xf32> to vector<1x16x128xf32>
      tpu.vector_store %arg11[%c0_50, %c0_51, %c0_52], %154 {strides = array<i32>} : memref<1x16x128xf32, #tpu.memory_space<vmem>>, vector<1x16x128xf32>,
    } else {
    }
    return
  }
  func.func @transform_0(%arg0: i32, %arg1: i32) -> (i32, i32, i32) {
    %c0_i32 = arith.constant 0 : i32
    %c0_i32_0 = arith.constant 0 : i32
    %c0_i32_1 = arith.constant 0 : i32
    return %arg0, %c0_i32, %c0_i32_0 : i32, i32, i32
  }
  func.func @transform_1(%arg0: i32, %arg1: i32) -> (i32, i32, i32) {
    %c0_i32 = arith.constant 0 : i32
    %c0_i32_0 = arith.constant 0 : i32
    %c0_i32_1 = arith.constant 0 : i32
    return %arg1, %c0_i32, %c0_i32_0 : i32, i32, i32
  }
  func.func @transform_2(%arg0: i32, %arg1: i32) -> (i32, i32, i32) {
    %c0_i32 = arith.constant 0 : i32
    %c0_i32_0 = arith.constant 0 : i32
    %c0_i32_1 = arith.constant 0 : i32
    return %arg1, %c0_i32, %c0_i32_0 : i32, i32, i32
  }
  func.func @transform_3(%arg0: i32, %arg1: i32) -> (i32, i32, i32) {
    %c0_i32 = arith.constant 0 : i32
    %c0_i32_0 = arith.constant 0 : i32
    %c0_i32_1 = arith.constant 0 : i32
    return %arg1, %c0_i32, %c0_i32_0 : i32, i32, i32
  }
  func.func @transform_4(%arg0: i32, %arg1: i32) -> (i32, i32, i32) {
    %c0_i32 = arith.constant 0 : i32
    %c0_i32_0 = arith.constant 0 : i32
    %c0_i32_1 = arith.constant 0 : i32
    return %arg1, %c0_i32, %c0_i32_0 : i32, i32, i32
  }
  func.func @transform_5(%arg0: i32, %arg1: i32) -> (i32, i32, i32) {
    %c0_i32 = arith.constant 0 : i32
    %c0_i32_0 = arith.constant 0 : i32
    %c0_i32_1 = arith.constant 0 : i32
    return %arg1, %c0_i32, %c0_i32_0 : i32, i32, i32
  }
  func.func @transform_6(%arg0: i32, %arg1: i32) -> (i32, i32, i32) {
    %c0_i32 = arith.constant 0 : i32
    %c0_i32_0 = arith.constant 0 : i32
    %c0_i32_1 = arith.constant 0 : i32
    return %arg1, %c0_i32, %c0_i32_0 : i32, i32, i32
  }
  func.func @transform_7(%arg0: i32, %arg1: i32) -> (i32, i32, i32) {
    %c0_i32 = arith.constant 0 : i32
    %c0_i32_0 = arith.constant 0 : i32
    %c0_i32_1 = arith.constant 0 : i32
    return %arg1, %c0_i32, %c0_i32_0 : i32, i32, i32
  }
  func.func @transform_8(%arg0: i32, %arg1: i32) -> (i32, i32, i32) {
    %c0_i32 = arith.constant 0 : i32
    %c0_i32_0 = arith.constant 0 : i32
    %c0_i32_1 = arith.constant 0 : i32
    return %arg1, %c0_i32, %c0_i32_0 : i32, i32, i32
  }
  func.func @transform_9(%arg0: i32, %arg1: i32) -> (i32, i32, i32) {
    %c0_i32 = arith.constant 0 : i32
    %c0_i32_0 = arith.constant 0 : i32
    %c0_i32_1 = arith.constant 0 : i32
    return %arg0, %c0_i32, %c0_i32_0 : i32, i32, i32
  }
}

</mosaic_0001>

<bundles_post_ra>
// kernel: transformer_forward.1
= control target key start
LH: loop header
LB: loop body
LE: loop exit
PB: predicated region body
PF: predicated region fallthrough
CT: control target
= control target key end

     0   :  { %s4194_s0 = inlined_call_operand.hbm [shape: f32[2,16,128], index: 0, kind: input, shape index: {}]   ;;  %s4195_s1 = inlined_call_operand.vmem [shape: f32[2,4,128], index: 1, kind: input, shape index: {}]   ;;  %s4196_s2 = inlined_call_operand.hbm [shape: bf16[2,128,768], index: 2, kind: input, shape index: {}]   ;;  %s4197_s3 = inlined_call_operand.hbm [shape: bf16[2,256,128], index: 3, kind: input, shape index: {}]   ;;  %s4198_s4 = inlined_call_operand.vmem [shape: f32[2,1,128], index: 4, kind: input, shape index: {}]   ;;  %s4199_s5 = inlined_call_operand.hbm [shape: bf16[2,128,256], index: 5, kind: input, shape index: {}]   ;;  %s4200_s6 = inlined_call_operand.hbm [shape: f32[2,1,256], index: 6, kind: input, shape index: {}]   ;;  %s4201_s7 = inlined_call_operand.hbm [shape: bf16[2,256,128], index: 7, kind: input, shape index: {}]   ;;  %s4202_s8 = inlined_call_operand.vmem [shape: f32[2,1,128], index: 8, kind: input, shape index: {}]   ;;  %s4203_s9 = inlined_call_operand.hbm [shape: f32[2,16,128], index: 9, kind: output, shape index: {}]  }
   0x1   :  { %4228 = sst [smem:[#allocation32_spill]] %s4194_s0 }
   0x2   :  { %4229 = sst [smem:[#allocation33_spill]] %s4195_s1 }
   0x3   :  { %4230 = sst [smem:[#allocation34_spill]] %s4196_s2 }
   0x4   :  { %4231 = sst [smem:[#allocation35_spill]] %s4197_s3 }
   0x5   :  { %4232 = sst [smem:[#allocation36_spill]] %s4198_s4 }
   0x6   :  { %4233 = sst [smem:[#allocation37_spill]] %s4199_s5 }
   0x7   :  { %4234 = sst [smem:[#allocation38_spill]] %s4200_s6 }
   0x8   :  { %4235 = sst [smem:[#allocation39_spill]] %s4201_s7 }
   0x9   :  { %4236 = sst [smem:[#allocation40_spill]] %s4202_s8 }
   0xa   :  { %4237 = sst [smem:[#allocation41_spill]] %s4203_s9 }
   0xb   :  { %14 = vsyncpa [#allocation4], 0 }
   0xc   :  { %16 = vsyncpa [#allocation4 + $0x1], 0 }
   0xd   :  { %17 = vsyncpa [#allocation7], 0 }
   0xe   :  { %19 = vsyncpa [#allocation7 + $0x1], 0 }
   0xf   :  { %20 = vsyncpa [#allocation10], 0 }
  0x10   :  { %22 = vsyncpa [#allocation10 + $0x1], 0 }
  0x11   :  { %23 = vsyncpa [#allocation13], 0 }
  0x12   :  { %25 = vsyncpa [#allocation13 + $0x1], 0 }
  0x13   :  { %26 = vsyncpa [#allocation5], 0 }
  0x14   :  { %28 = vsyncpa [#allocation5 + $0x1], 0  ;;  %s3430_s30 = smov 0   ;;  %s3432_s10 = smov 0  }
  0x15   :  { %s3434_s11 = smov 0   ;;  %s3436_s12 = smov 0  }
  0x16   :  { %s3438_s13 = smov 0   ;;  %s3440_s14 = smov 0  }
  0x17   :  { %s3442_s15 = smov 0   ;;  %s3444_s16 = smov 0  }
  0x18   :  { %s3446_s17 = smov 0   ;;  %s3448_s18 = smov 0  }
  0x19   :  { %s3450_s19 = smov 0  }
  0x1a LB: > { %4238 = sst [smem:[#allocation20_spill]] %s3323_s10  ;;  %p4207_p0 = scmp.eq.s32.totalorder %s3359_s19, 0  ;;  %s3359_s19 = sphi %s3450_s19, %s34_s19   ;;  %s3355_s18 = sphi %s3448_s18, %s4302_s18   ;;  %s3351_s17 = sphi %s3446_s17, %s4308_s17   ;;  %s3347_s16 = sphi %s3444_s16, %s4300_s16   ;;  %s3343_s15 = sphi %s3442_s15, %s4307_s15   ;;  %s3339_s14 = sphi %s3440_s14, %s4299_s14   ;;  %s3335_s13 = sphi %s3438_s13, %s4306_s13   ;;  %s3331_s12 = sphi %s3436_s12, %s4305_s12   ;;  %s3327_s11 = sphi %s3434_s11, %s4304_s11   ;;  %s3323_s10 = sphi %s3432_s10, %s4303_s10   ;;  %s3319_s30 = sphi %s3430_s30, %s4296_s30  }
  0x1b   : > { %4239 = sst [smem:[#allocation21_spill]] %s3339_s14  ;;  %p112_p1 = scmp.ne.s32.totalorder %s3327_s11, %s3323_s10 }
  0x1c   : > { %4240 = sst [smem:[#allocation22_spill]] %s3343_s15  ;;  %p4205_p4 = scmp.lt.s32.totalorder %s3359_s19, 4 }
  0x1d   : > { %4241 = sst [smem:[#allocation23_spill]] %s3347_s16  ;;  %p114_p3 = por %p112_p1, %p4207_p0 }
  0x1e   : > { %4242 = sst [smem:[#allocation24_spill]] %s3355_s18  ;;  %s4206_s22 = sand.u32 1, %s3359_s19  }
  0x1f   : > { %s3497_s23 = sand.u32 1, %s3327_s11   ;;  %s2686_s25 = smul.u32 6144, %s3351_s17 }
  0x20   : > { %s2685_s24 = smul.u32 384, %s3497_s23  ;;  %p3503_p5 = pnand %p4205_p4, %p114_p3 }
  0x21   : > { %s4244_s2 = sld [smem:[#allocation34_spill]]  ;;  %s3517_s9 = scalar_lea.sflag [#allocation7], %s4206_s22 }
  0x22   : > { %s4243_s26 = scalar_select %p3503_p5, 1, 0 }
  0x23   : > { %s356_s21 = scalar_lea.vmem [#allocation6], %s2685_s24  ;;  %p3523_p8 = pneg %p3503_p5 }
  0x24   : > { %s363_s20 = sshll.u32 %s356_s21, 4  ;;  %s3512_s20 = int_to_ptr.vmem [resolvable:$true] %s363_s20 }
  0x27   : > { %s3510_s29 = scalar_lea.hbm %s4244_s2, %s2686_s25  ;;  %s3050_s21 = scalar_lea.hbm %s4244_s2, 12288 }
  0x28   : > { %s3045_s16 = scalar_lea.hbm %s3510_s29, 6144  ;;  %p3051_p11 = scmp.lt.u32.totalorder %s3510_s29, %s4244_s2 }
  0x29   : > { %p3046_p7 = scmp.ne.s32.totalorder %s3510_s29, %s3045_s16  ;;  %p3052_p12 = scmp.lt.u32.totalorder %s3050_s21, %s3045_s16 }
  0x2a   : > { %p3054_p1 = scmp.lt.u32.totalorder %s3045_s16, %s3510_s29 }
  0x2b   : > { %p3048_p9 = pnand %p3523_p8, %p3046_p7  ;;  %p3053_p13 = por %p3052_p12, %p3051_p11 }
  0x2d   : > { %p3049_p10 = pneg %p3048_p9  ;;  %p3055_p3 = por %p3054_p1, %p3053_p13 }
  0x2f   : > { %p3056_p4 = pnand %p3055_p3, %p3049_p10 }
  0x31   : > { %3059 = shalt.err (!%p3056_p4)
}
  0x32   : > { %s3060_s22 = scalar_lea.vmem %s3512_s20, 6144  ;;  %s3361_s25 = smov [#allocation6]  }
  0x33   : > { %p3061_p7 = scmp.ne.s32.totalorder %s3512_s20, %s3060_s22  ;;  %s3065_s24 = sshll.u32 %s3361_s25, 4  ;;  %s3066_s24 = int_to_ptr.vmem [resolvable:$false] %s3065_s24 }
  0x34   : > { %s3067_s8 = scalar_lea.vmem %s3066_s24, 12288  ;;  %p3068_p0 = scmp.lt.s32.totalorder %s3512_s20, %s3066_s24 }
  0x35   : > { %p3063_p9 = pnand %p3061_p7, %p3523_p8  ;;  %p3069_p6 = scmp.lt.s32.totalorder %s3067_s8, %s3060_s22 }
  0x37   : > { %p3064_p2 = pneg %p3063_p9  ;;  %p3070_p11 = por %p3069_p6, %p3068_p0 }
  0x39   : > { %p3071_p12 = pnand %p3070_p11, %p3064_p2 }
  0x3b   : > { %3074 = shalt.err (!%p3071_p12)
}
  0x3c   : > { %s3362_s16 = smov 384   ;;  %s3363_s21 = smov 24  }
  0x3d   : > { %2708 = dma.hbm_to_vmem [thread:$0]  (!%p3503_p5), %s3510_s29, 6144, %s3512_s20, %s3517_s9, %s3362_s16, %s3362_s16, %s3363_s21  }
  0x3e   : > { %p465_p4 = scmp.lt.s32.totalorder %s3359_s19, 5  ;;  %s3549_s28 = sshll.u32 %s3497_s23, 7 }
  0x3f   : > { %p4246_p0 = scmp.ge.s32.totalorder %s3359_s19, 1  ;;  %s3558_s25 = sshll.u32 %s3351_s17, 11 }
  0x40   : > { %s4249_s5 = sld [smem:[#allocation37_spill]]  ;;  %s404_s20 = scalar_lea.vmem [#allocation9], %s3549_s28 }
  0x41   : > { %p3553_p2 = pnand %p4246_p0, %p465_p4  ;;  %s411_s29 = sshll.u32 %s404_s20, 4  ;;  %s3567_s29 = int_to_ptr.vmem [resolvable:$true] %s411_s29 }
  0x42   : > { %s4250_s16 = sand.u32 1, %s3359_s19  }
  0x43   : > { %s4247_s22 = scalar_select %p3553_p2, 1, 0 }
  0x44   : > { %s3571_s21 = scalar_lea.sflag [#allocation10], %s4250_s16 }
  0x45   : > { %4248 = sst [smem:[#allocation25_spill]] %s4247_s22 }
  0x46   : > { %s3564_s2 = scalar_lea.hbm %s4249_s5, %s3558_s25  ;;  %4251 = sst [smem:[#allocation26_spill]] %s3571_s21 }
  0x47   : > { %s3075_s1 = scalar_lea.hbm %s3564_s2, 2048  ;;  %s3080_s8 = scalar_lea.hbm %s4249_s5, 4096 }
  0x48   : > { %p3076_p6 = scmp.ne.s32.totalorder %s3564_s2, %s3075_s1  ;;  %p3081_p1 = scmp.lt.u32.totalorder %s3564_s2, %s4249_s5 }
  0x49   : > { %p3082_p3 = scmp.lt.u32.totalorder %s3080_s8, %s3075_s1  ;;  %p3084_p9 = scmp.lt.u32.totalorder %s3075_s1, %s3564_s2 }
  0x4a   : > { %p3078_p10 = pnand %p3076_p6, %p3523_p8 }
  0x4b   : > { %p3083_p7 = por %p3082_p3, %p3081_p1 }
  0x4c   : > { %p3079_p13 = pneg %p3078_p10 }
  0x4d   : > { %p3085_p11 = por %p3084_p9, %p3083_p7 }
  0x4f   : > { %p3086_p12 = pnand %p3085_p11, %p3079_p13 }
  0x51   : > { %3089 = shalt.err (!%p3086_p12)
}
  0x52   : > { %s3090_s20 = scalar_lea.vmem %s3567_s29, 2048  ;;  %s3364_s4 = smov [#allocation9]  }
  0x53   : > { %p3091_p4 = scmp.ne.s32.totalorder %s3567_s29, %s3090_s20  ;;  %s3095_s16 = sshll.u32 %s3364_s4, 4  ;;  %s3096_s16 = int_to_ptr.vmem [resolvable:$false] %s3095_s16 }
  0x54   : > { %s3097_s15 = scalar_lea.vmem %s3096_s16, 4096  ;;  %p3098_p10 = scmp.lt.s32.totalorder %s3567_s29, %s3096_s16 }
  0x55   : > { %p3093_p0 = pnand %p3091_p4, %p3523_p8  ;;  %p3099_p2 = scmp.lt.s32.totalorder %s3097_s15, %s3090_s20 }
  0x57   : > { %p3094_p6 = pneg %p3093_p0  ;;  %p3100_p1 = por %p3099_p2, %p3098_p10 }
  0x59   : > { %p3101_p3 = pnand %p3100_p1, %p3094_p6 }
  0x5b   : > { %3104 = shalt.err (!%p3101_p3)
}
  0x5c   : > { %s4210_s1 = smov 128   ;;  %s4211_s22 = smov 8  }
  0x5d   : > { %2714 = dma.hbm_to_vmem [thread:$0]  (!%p3503_p5), %s3564_s2, 2048, %s3567_s29, %s3571_s21, %s4210_s1, %s4210_s1, %s4211_s22  }
  0x5e   : > { %s3599_s24 = sadd.s32 4294967295, %s3359_s19   ;;  %s2431_s8 = sadd.s32 4294967294, %s3359_s19  }
  0x5f   : > { %s4252_s20 = sadd.s32 1, %s3351_s17  ;;  %s46_s4 = sadd.s32 1, %s3355_s18 }
  0x60   : > { %p44_p2 = scmp.ge.s32.totalorder %s4252_s20, 2  ;;  %s53_s16 = sadd.s32 1, %s3339_s14 }
  0x61   : > { %s4253_s15 = smov %s4252_s20  ;;  %p60_p13 = scmp.ne.s32.totalorder %s3339_s14, %s3335_s13 }
  0x62   : > { %s4310_s15 = smov (%p44_p2, %s4253_s15), 0  ;;  %s4312_s4 = smov (!%p44_p2, %s46_s4), %s3355_s18 }
  0x63   : > { %4254 = sst [smem:[#allocation27_spill]] %s4310_s15  ;;  %p66_p7 = scmp.ne.s32.totalorder %s3335_s13, %s3331_s12 }
  0x64   : > { %p48_p9 = scmp.ge.s32.totalorder %s4312_s4, 2  ;;  %p67_p11 = scmp.eq.s32.totalorder %s3599_s24, 0 }
  0x65   : > { %p4255_p12 = scmp.eq.s32.totalorder %s3359_s19, 0  ;;  %s102_s29 = ssub.s32 %s3351_s17, %s4310_s15 }
  0x66   : > { %s4314_s4 = smov (%p48_p9, %s4312_s4), 0  ;;  %p3632_p0 = por %p67_p11, %p66_p7 }
  0x67   : > { %p3621_p4 = por %p4255_p12, %p60_p13  ;;  %4257 = sst [smem:[#allocation28_spill]] %s4314_s4 }
  0x68   : > { %s4258_s20 = scalar_select %p3632_p0, 1, 0 }
  0x69   : > { %p103_p6 = scmp.eq.s32.totalorder %s102_s29, 0  ;;  %s50_s1 = ssub.s32 %s3355_s18, %s4314_s4 }
  0x6a   : > { %p4259_p10 = scmp.ne.s32.totalorder %s3323_s10, %s3319_s30  ;;  %p51_p3 = scmp.eq.s32.totalorder %s50_s1, 0 }
  0x6b   : > { %p298_p2 = scmp.eq.s32.totalorder %s3599_s24, 3  ;;  %s4262_s5 = sadd.s32 1, %s3327_s11 }
  0x6c   : > { %p3641_p1 = por %p4259_p10, %p67_p11  ;;  %p304_p12 = scmp.eq.s32.totalorder %s2431_s8, 3 }
  0x6d   : > { %s3649_s15 = scalar_select %p103_p6, %s3327_s11, %s4262_s5  }
  0x6e   : > { %s4260_s22 = scalar_select %p3641_p1, 1, 0 }
  0x6f   : > { %4263 = sst [smem:[#allocation30_spill]] %s3649_s15  ;;  %p3657_p9 = por %p298_p2, %p60_p13 }
  0x70   : > { %4261 = sst [smem:[#allocation29_spill]] %s4260_s22  ;;  %s324_s29 = sand.u32 1, %s3339_s14  }
  0x71   : > { %s3652_s7 = scalar_select %p51_p3, %s3339_s14, %s53_s16  }
  0x72   : > { %s4265_s21 = scalar_select %p3657_p9, 1, 0 }
  0x73   : > { %4264 = sst [smem:[#allocation31_spill]] %s3652_s7  ;;  %s2571_s4 = sshll.u32 %s3355_s18, 8 }
  0x74   : > { %p3666_p11 = por %p304_p12, %p66_p7  ;;  %s2434_s1 = sshll.u32 %s324_s29, 4 }
  0x75   : > { %s4267_s0 = sld [smem:[#allocation32_spill]]  ;;  %p4268_p6 = scmp.lt.s32.totalorder %s3359_s19, 4 }
  0x76   : > { %s4266_s30 = scalar_select %p3666_p11, 1, 0 }
  0x77   : > { %p3679_p13 = pnand %p4268_p6, %p3621_p4  ;;  %s328_s16 = scalar_lea.vmem [#allocation3], %s2434_s1 }
  0x78   : > { %s335_s18 = sshll.u32 %s328_s16, 4  ;;  %s3685_s7 = scalar_lea.sflag [#allocation4], %s324_s29  ;;  %s3683_s18 = int_to_ptr.vmem [resolvable:$true] %s335_s18 }
  0x79   : > { %p3107_p10 = pneg %p3679_p13 }
  0x7b   : > { %s3673_s5 = scalar_lea.hbm %s4267_s0, %s2571_s4  ;;  %s3110_s2 = scalar_lea.hbm %s4267_s0, 512 }
  0x7c   : > { %s3105_s10 = scalar_lea.hbm %s3673_s5, 256  ;;  %p3111_p4 = scmp.lt.u32.totalorder %s3673_s5, %s4267_s0 }
  0x7d   : > { %p3106_p7 = scmp.ne.s32.totalorder %s3673_s5, %s3105_s10  ;;  %p3112_p12 = scmp.lt.u32.totalorder %s3110_s2, %s3105_s10 }
  0x7e   : > { %p3114_p11 = scmp.lt.u32.totalorder %s3105_s10, %s3673_s5 }
  0x7f   : > { %p3108_p3 = pnand %p3107_p10, %p3106_p7  ;;  %p3113_p6 = por %p3112_p12, %p3111_p4 }
  0x81   : > { %p3109_p2 = pneg %p3108_p3  ;;  %p3115_p9 = por %p3114_p11, %p3113_p6 }
  0x83   : > { %p3116_p1 = pnand %p3115_p9, %p3109_p2 }
  0x85   : > { %3119 = shalt.err (!%p3116_p1)
}
  0x86   : > { %s3120_s29 = scalar_lea.vmem %s3683_s18, 256  ;;  %s3367_s1 = smov [#allocation3]  }
  0x87   : > { %p3121_p7 = scmp.ne.s32.totalorder %s3683_s18, %s3120_s29  ;;  %s3125_s16 = sshll.u32 %s3367_s1, 4  ;;  %s3126_s16 = int_to_ptr.vmem [resolvable:$false] %s3125_s16 }
  0x88   : > { %s3127_s14 = scalar_lea.vmem %s3126_s16, 512  ;;  %p3128_p5 = scmp.lt.s32.totalorder %s3683_s18, %s3126_s16 }
  0x89   : > { %p3123_p3 = pnand %p3121_p7, %p3107_p10  ;;  %p3129_p4 = scmp.lt.s32.totalorder %s3127_s14, %s3120_s29 }
  0x8b   : > { %p3124_p0 = pneg %p3123_p3  ;;  %p3130_p12 = por %p3129_p4, %p3128_p5 }
  0x8d   : > { %p3131_p11 = pnand %p3130_p12, %p3124_p0 }
  0x8f   : > { %3134 = shalt.err (!%p3131_p11)
}
  0x90   : > { %s4270_s15 = smov 8   ;;  %s4271_s10 = smov 128  }
  0x91   : > { %2705 = dma.hbm_to_vmem [thread:$0]  (!%p3679_p13), %s3673_s5, 256, %s3683_s18, %s3685_s7, %s4271_s10, %s4271_s10, %s4270_s15  }
  0x92   : > { %s4272_s3 = sld [smem:[#allocation35_spill]]  ;;  %s377_s8 = scalar_lea.vmem [#allocation8], %s3549_s28 }
  0x93   : > { %s384_s29 = sshll.u32 %s377_s8, 4  ;;  %s2444_s1 = sshll.u32 %s3497_s23, 1  ;;  %s3723_s29 = int_to_ptr.vmem [resolvable:$true] %s384_s29 }
  0x98   : > { %s3720_s2 = scalar_lea.hbm %s4272_s3, %s3558_s25  ;;  %s3140_s5 = scalar_lea.hbm %s4272_s3, 4096 }
  0x99   : > { %s3135_s16 = scalar_lea.hbm %s3720_s2, 2048  ;;  %p3141_p9 = scmp.lt.u32.totalorder %s3720_s2, %s4272_s3 }
  0x9a   : > { %p3136_p5 = scmp.ne.s32.totalorder %s3720_s2, %s3135_s16  ;;  %p3142_p13 = scmp.lt.u32.totalorder %s3140_s5, %s3135_s16 }
  0x9b   : > { %p3144_p2 = scmp.lt.u32.totalorder %s3135_s16, %s3720_s2 }
  0x9c   : > { %p3138_p0 = pnand %p3136_p5, %p3523_p8  ;;  %p3143_p10 = por %p3142_p13, %p3141_p9 }
  0x9e   : > { %p3139_p1 = pneg %p3138_p0  ;;  %p3145_p6 = por %p3144_p2, %p3143_p10 }
  0xa0   : > { %p3146_p7 = pnand %p3145_p6, %p3139_p1 }
  0xa2   : > { %3149 = shalt.err (!%p3146_p7)
}
  0xa3   : > { %s3150_s10 = scalar_lea.vmem %s3723_s29, 2048  ;;  %s3368_s22 = smov [#allocation8]  }
  0xa4   : > { %p3151_p3 = scmp.ne.s32.totalorder %s3723_s29, %s3150_s10  ;;  %s3155_s4 = sshll.u32 %s3368_s22, 4  ;;  %s3156_s4 = int_to_ptr.vmem [resolvable:$false] %s3155_s4 }
  0xa5   : > { %s3157_s8 = scalar_lea.vmem %s3156_s4, 4096  ;;  %p3158_p11 = scmp.lt.s32.totalorder %s3723_s29, %s3156_s4 }
  0xa6   : > { %p3153_p4 = pnand %p3151_p3, %p3523_p8  ;;  %p3159_p5 = scmp.lt.s32.totalorder %s3157_s8, %s3150_s10 }
  0xa8   : > { %p3154_p12 = pneg %p3153_p4  ;;  %p3160_p0 = por %p3159_p5, %p3158_p11 }
  0xaa   : > { %p3161_p9 = pnand %p3160_p0, %p3154_p12 }
  0xac   : > { %3164 = shalt.err (!%p3161_p9)
}
  0xad   : > { %s3369_s16 = smov 64   ;;  %s3370_s7 = smov 4  }
  0xae   : > { %p4273_p1 = scmp.ne.s32.totalorder %s4243_s26, 0  ;;  %s2574_s18 = sshll.u32 %s3351_s17, 5 }
  0xaf   : > { %s4274_s6 = sld [smem:[#allocation38_spill]]  ;;  %s425_s10 = scalar_lea.vmem [#allocation11], %s2444_s1 }
  0xb0   : > { %2711 = dma.hbm_to_vmem [thread:$0]  (!%p4273_p1), %s3720_s2, 2048, %s3723_s29, %s3517_s9, %s3369_s16, %s3369_s16, %s3370_s7  }
  0xb1   : > { %s433_s22 = sshll.u32 %s425_s10, 4  ;;  %s434_s22 = int_to_ptr.vmem [resolvable:$true] %s433_s22 }
  0xb5   : > { %s3755_s15 = scalar_lea.hbm %s4274_s6, %s2574_s18  ;;  %s3170_s29 = scalar_lea.hbm %s4274_s6, 64 }
  0xb6   : > { %s3165_s4 = scalar_lea.hbm %s3755_s15, 32  ;;  %p3171_p6 = scmp.lt.u32.totalorder %s3755_s15, %s4274_s6 }
  0xb7   : > { %p3166_p13 = scmp.ne.s32.totalorder %s3755_s15, %s3165_s4  ;;  %p3172_p7 = scmp.lt.u32.totalorder %s3170_s29, %s3165_s4 }
  0xb8   : > { %p3174_p4 = scmp.lt.u32.totalorder %s3165_s4, %s3755_s15 }
  0xb9   : > { %p3168_p10 = pnand %p3166_p13, %p3523_p8  ;;  %p3173_p3 = por %p3172_p7, %p3171_p6 }
  0xbb   : > { %p3169_p2 = pneg %p3168_p10  ;;  %p3175_p12 = por %p3174_p4, %p3173_p3 }
  0xbd   : > { %p3176_p11 = pnand %p3175_p12, %p3169_p2 }
  0xbf   : > { %3179 = shalt.err (!%p3176_p11)
}
  0xc0   : > { %s3180_s1 = scalar_lea.vmem %s434_s22, 32  ;;  %s3371_s5 = smov [#allocation11]  }
  0xc1   : > { %p3181_p5 = scmp.ne.s32.totalorder %s434_s22, %s3180_s1  ;;  %s3185_s14 = sshll.u32 %s3371_s5, 4  ;;  %s3186_s14 = int_to_ptr.vmem [resolvable:$false] %s3185_s14 }
  0xc2   : > { %s3187_s10 = scalar_lea.vmem %s3186_s14, 64  ;;  %p3188_p13 = scmp.lt.s32.totalorder %s434_s22, %s3186_s14 }
  0xc3   : > { %p3183_p0 = pnand %p3181_p5, %p3523_p8  ;;  %p3189_p10 = scmp.lt.s32.totalorder %s3187_s10, %s3180_s1 }
  0xc5   : > { %p3184_p9 = pneg %p3183_p0  ;;  %p3190_p1 = por %p3189_p10, %p3188_p13 }
  0xc7   : > { %p3191_p6 = pnand %p3190_p1, %p3184_p9 }
  0xc9   : > { %3194 = shalt.err (!%p3191_p6)
}
  0xca   : > { %p4275_p7 = scmp.ne.s32.totalorder %s4243_s26, 0  ;;  %s4276_s4 = sld [smem:[#allocation26_spill]] }
  0xcb   : > { %s4277_s29 = sld [smem:[#allocation39_spill]]  ;;  %s444_s18 = scalar_lea.vmem [#allocation12], %s3549_s28 }
  0xcc   : > { %s451_s1 = sshll.u32 %s444_s18, 4  ;;  %s441_s5 = scalar_lea.sflag [#allocation13], %s3497_s23  ;;  %s3784_s1 = int_to_ptr.vmem [resolvable:$true] %s451_s1 }
  0xd0   : > { %2717 = dma.hbm_to_vmem [thread:$0]  (!%p4275_p7), %s3755_s15, 32, %s434_s22, %s4276_s4  }
  0xd1   : > { %s3781_s8 = scalar_lea.hbm %s4277_s29, %s3558_s25  ;;  %s3200_s10 = scalar_lea.hbm %s4277_s29, 4096 }
  0xd2   : > { %s3195_s14 = scalar_lea.hbm %s3781_s8, 2048  ;;  %p3201_p4 = scmp.lt.u32.totalorder %s3781_s8, %s4277_s29 }
  0xd3   : > { %p3196_p1 = scmp.ne.s32.totalorder %s3781_s8, %s3195_s14  ;;  %p3202_p12 = scmp.lt.u32.totalorder %s3200_s10, %s3195_s14 }
  0xd4   : > { %p3204_p5 = scmp.lt.u32.totalorder %s3195_s14, %s3781_s8 }
  0xd5   : > { %p3198_p2 = pnand %p3196_p1, %p3523_p8  ;;  %p3203_p11 = por %p3202_p12, %p3201_p4 }
  0xd7   : > { %p3199_p3 = pneg %p3198_p2  ;;  %p3205_p0 = por %p3204_p5, %p3203_p11 }
  0xd9   : > { %p3206_p9 = pnand %p3205_p0, %p3199_p3 }
  0xdb   : > { %3209 = shalt.err (!%p3206_p9)
}
  0xdc   : > { %s3210_s28 = scalar_lea.vmem %s3784_s1, 2048  ;;  %s3372_s9 = smov [#allocation12]  }
  0xdd   : > { %p3211_p13 = scmp.ne.s32.totalorder %s3784_s1, %s3210_s28  ;;  %s3215_s2 = sshll.u32 %s3372_s9, 4  ;;  %s3216_s2 = int_to_ptr.vmem [resolvable:$false] %s3215_s2 }
  0xde   : > { %s3217_s18 = scalar_lea.vmem %s3216_s2, 4096  ;;  %p3218_p1 = scmp.lt.s32.totalorder %s3784_s1, %s3216_s2 }
  0xdf   : > { %p3213_p10 = pnand %p3211_p13, %p3523_p8  ;;  %p3219_p2 = scmp.lt.s32.totalorder %s3217_s18, %s3210_s28 }
  0xe1   : > { %p3214_p6 = pneg %p3213_p10  ;;  %p3220_p4 = por %p3219_p2, %p3218_p1 }
  0xe3   : > { %p3221_p12 = pnand %p3220_p4, %p3214_p6 }
  0xe5   : > { %3224 = shalt.err (!%p3221_p12)
}
  0xe6   : > { %2720 = dma.hbm_to_vmem [thread:$0]  (!%p4275_p7), %s3781_s8, 2048, %s3784_s1, %s441_s5, %s3369_s16, %s3369_s16, %s3370_s7  }
  0xe7   : > { %s4278_s27 = sld [smem:[#allocation25_spill]] }
  0xed   : > { %p4279_p8 = scmp.ne.s32.totalorder %s4278_s27, 0 }
  0xee   : > { %s3816_s14 = sand.u32 (!%p4279_p8), 1, %s3335_s13   ;;  %p4280_p3 = scmp.ne.s32.totalorder (!%p4279_p8), %s4258_s20, 0 }
  0xef   : > { %469 = sbr.rel (%p4279_p8) target bundleno = 2868 (0xb34), region = 56  ;;  %s4226_s15 = sshll.u32 (!%p4279_p8), %s3816_s14, 4 }
  0xf0   : > { %s472_s26 = scalar_lea.sflag (!%p4279_p8), [#allocation4], %s3816_s14  ;;  %s3822_s22 = scalar_lea.vmem (!%p4279_p8), [#allocation3], %s4226_s15 }
  0xf6   : > { %3298 = dma.done.wait (%p4280_p3), %s472_s26, 256  }
  0xf7   : > { %3300 = vsyncadd (%p4280_p3), %s472_s26, 4294967040  ;;  %s4281_s23 = sld [smem:[#allocation20_spill]]  ;;  %s4282_s16 = sld [smem:[#allocation29_spill]] }
  0xf8   : > { %s480_s7 = sand.u32 1, %s3599_s24  }
  0xf9   : > { %s481_s5 = scalar_lea.sflag [#allocation7], %s480_s7 }
  0xfd   : > { %s482_s8 = sand.u32 1, %s4281_s23   ;;  %p4283_p7 = scmp.ne.s32.totalorder %s4282_s16, 0 }
  0xfe   : > { %s2687_s1 = smul.u32 384, %s482_s8 }
 0x100   : > { %s3830_s10 = scalar_lea.vmem [#allocation6], %s2687_s1 }
 0x101   : > { %3302 = dma.done.wait (%p4283_p7), %s481_s5, 8192  }
 0x102   : > { %3304 = vsyncadd (%p4283_p7), %s481_s5, 4294959104  ;;  %s2452_s25 = sshll.u32 %s482_s8, 7  ;;  %s499_s20 = scalar_lea.sflag [#allocation10], %s480_s7 }
 0x103   : > { %s3836_s4 = scalar_lea.vmem [#allocation8], %s2452_s25  ;;  %s3838_s28 = scalar_lea.vmem [#allocation9], %s2452_s25 }
 0x104   : > { %3306 = dma.done.wait (%p4283_p7), %s499_s20, 2080  }
 0x105   : > { %3308 = vsyncadd (%p4283_p7), %s499_s20, 4294965216  ;;  %s2454_s24 = sshll.u32 %s482_s8, 1  ;;  %s517_s2 = scalar_lea.sflag [#allocation13], %s482_s8 }
 0x106   : > { %s3844_s9 = scalar_lea.vmem [#allocation11], %s2454_s24  ;;  %s3846_s18 = scalar_lea.vmem [#allocation12], %s2452_s25 }
 0x107   : > { %3310 = dma.done.wait (%p4283_p7), %s517_s2, 2048  }
 0x108   : > { %3312 = vsyncadd (%p4283_p7), %s517_s2, 4294965248  ;;  %s4284_s27 = sld [smem:[#allocation22_spill]]  ;;  %s4285_s8 = sld [smem:[#allocation36_spill]] }
 0x109   : > { %s4286_s24 = sld [smem:[#allocation33_spill]]  ;;  %s4287_s0 = sld [smem:[#allocation40_spill]] }
 0x10a   : > { %s4288_s6 = sshll.u32 %s3816_s14, 4 }
 0x10b   : > { %s3872_s29 = scalar_lea.vmem [#allocation14], %s4288_s6 }
 0x10e   : > { %p590_p11 = scmp.lt.s32.totalorder %s4284_s27, 1  ;;  %p2458_p5 = scmp.ne.s32.totalorder %s4284_s27, 0 }
 0x10f   : > { %v605_v0 = vld [vmem:[%s3822_s22] sm:$0xff] (!%p2458_p5)  ;;  %v606_v1 = vld [vmem:[%s3822_s22 + $0x8] sm:$0xff] (!%p2458_p5) }
 0x110   : > { %s3854_s26 = scalar_select %p590_p11, %s4284_s27, 1 }
 0x111   : > { %604 = sbr.rel (%p2458_p5) target bundleno = 280 (0x118), region = 84  ;;  %607 = vst [vmem:[#allocation2] sm:$0xff] (!%p2458_p5), %v605_v0  ;;  %608 = vst [vmem:[#allocation2 + $0x8] sm:$0xff] (!%p2458_p5), %v606_v1 }
 0x112   : > { %s2457_s23 = sshll.u32 %s3854_s26, 2  ;;  %s596_s5 = scalar_lea.vmem %s4285_s8, %s3854_s26 }
 0x113   : > { %s3864_s15 = scalar_lea.vmem %s4286_s24, %s2457_s23  ;;  %s599_s3 = scalar_lea.vmem %s4287_s0, %s3854_s26 }
 0x118 PF: > { %v609_v2 = vld [vmem:[#allocation2] sm:$0xff]  ;;  %v610_v3 = vld [vmem:[#allocation2 + $0x8] sm:$0xff]  ;;  %v2870_v6 = vld [vmem:[%s3830_s10 + $0xc] ss:$24 sps:$4 sm:$0xff]   ;;  %v3373_v38 = vmov 0   ;;  %v635_v50 = vlaneseq  ;;  %vm3375_vm0 = vmmov 0  }
 0x119   : > { %612 = vadd.xlane.f32.xlu0 %v609_v2  ;;  %v2867_v4 = vld [vmem:[%s3830_s10 + $0x4] ss:$24 sps:$4 sm:$0xff]   ;;  %v2869_v5 = vld [vmem:[%s3830_s10] ss:$24 sps:$4 sm:$0xff]   ;;  %v2873_v8 = vld [vmem:[%s3830_s10 + $0x34] ss:$24 sps:$4 sm:$0xff]   ;;  %979 = vmatprep.subr.bf16.mxu1 %v2870_v6 }
 0x11a   : > { %v2872_v7 = vld [vmem:[%s3830_s10 + $0x8] ss:$24 sps:$4 sm:$0xff]   ;;  %936 = vmatprep.subr.bf16.mxu0 %v2867_v4  ;;  %v2876_v10 = vld [vmem:[%s3830_s10 + $0x3c] ss:$24 sps:$4 sm:$0xff]   ;;  %v2878_v19 = vld [vmem:[%s3830_s10 + $0x38] ss:$24 sps:$4 sm:$0xff]   ;;  %968 = vmatprep.mubr.bf16.mxu0 %v3373_v38 }
 0x11b   : > { %v2875_v9 = vld [vmem:[%s3830_s10 + $0x30] ss:$24 sps:$4 sm:$0xff]   ;;  %937 = vmatpush1.bf16.msra.mxu0 %v2869_v5  ;;  %980 = vmatpush1.bf16.msra.mxu1 %v2872_v7  ;;  %v2879_v20 = vld [vmem:[%s3830_s10 + $0x64] ss:$24 sps:$4 sm:$0xff]   ;;  %v2881_v21 = vld [vmem:[%s3830_s10 + $0x60] ss:$24 sps:$4 sm:$0xff]  }
 0x11c   : > { %938 = vmatprep.subr.bf16.mxu0 %v2873_v8  ;;  %981 = vmatprep.subr.bf16.mxu1 %v2876_v10  ;;  %v2882_v22 = vld [vmem:[%s3830_s10 + $0x6c] ss:$24 sps:$4 sm:$0xff]   ;;  %v2884_v23 = vld [vmem:[%s3830_s10 + $0x68] ss:$24 sps:$4 sm:$0xff]   ;;  %v2888_v26 = vld [vmem:[%s3830_s10 + $0x9c] ss:$24 sps:$4 sm:$0xff]  }
 0x11d   : > { %614 = vadd.xlane.f32.xlu0 %v610_v3  ;;  %v2885_v24 = vld [vmem:[%s3830_s10 + $0x94] ss:$24 sps:$4 sm:$0xff]   ;;  %v2887_v25 = vld [vmem:[%s3830_s10 + $0x90] ss:$24 sps:$4 sm:$0xff]   ;;  %v2891_v28 = vld [vmem:[%s3830_s10 + $0xc4] ss:$24 sps:$4 sm:$0xff]   ;;  %1011 = vmatprep.mubr.bf16.mxu1 %v3373_v38 }
 0x11e   : > { %v2890_v27 = vld [vmem:[%s3830_s10 + $0x98] ss:$24 sps:$4 sm:$0xff]   ;;  %v2894_v30 = vld [vmem:[%s3830_s10 + $0xcc] ss:$24 sps:$4 sm:$0xff]   ;;  %v2896_v31 = vld [vmem:[%s3830_s10 + $0xc8] ss:$24 sps:$4 sm:$0xff]  }
 0x11f   : > { %939 = vmatpush1.bf16.msra.mxu0 %v2875_v9  ;;  %982 = vmatpush1.bf16.msra.mxu1 %v2878_v19  ;;  %v2893_v29 = vld [vmem:[%s3830_s10 + $0xc0] ss:$24 sps:$4 sm:$0xff]   ;;  %v2897_v32 = vld [vmem:[%s3830_s10 + $0xf4] ss:$24 sps:$4 sm:$0xff]   ;;  %v2899_v34 = vld [vmem:[%s3830_s10 + $0xf0] ss:$24 sps:$4 sm:$0xff]  }
 0x120   : > { %940 = vmatprep.subr.bf16.mxu0 %v2879_v20  ;;  %983 = vmatprep.subr.bf16.mxu1 %v2882_v22  ;;  %v2900_v33 = vld [vmem:[%s3830_s10 + $0xfc] ss:$24 sps:$4 sm:$0xff]   ;;  %v2902_v35 = vld [vmem:[%s3830_s10 + $0xf8] ss:$24 sps:$4 sm:$0xff]   ;;  %v2906_v37 = vld [vmem:[%s3830_s10 + $0x12c] ss:$24 sps:$4 sm:$0xff]  }
 0x121   : > { %v2903_v36 = vld [vmem:[%s3830_s10 + $0x124] ss:$24 sps:$4 sm:$0xff]   ;;  %v2905_v39 = vld [vmem:[%s3830_s10 + $0x120] ss:$24 sps:$4 sm:$0xff]   ;;  %v2909_v41 = vld [vmem:[%s3830_s10 + $0x154] ss:$24 sps:$4 sm:$0xff]  }
 0x122   : > { %v2908_v40 = vld [vmem:[%s3830_s10 + $0x128] ss:$24 sps:$4 sm:$0xff]   ;;  %v2912_v42 = vld [vmem:[%s3830_s10 + $0x15c] ss:$24 sps:$4 sm:$0xff]   ;;  %v2914_v44 = vld [vmem:[%s3830_s10 + $0x158] ss:$24 sps:$4 sm:$0xff]  }
 0x123   : > { %941 = vmatpush1.bf16.msra.mxu0 %v2881_v21  ;;  %984 = vmatpush1.bf16.msra.mxu1 %v2884_v23  ;;  %v2911_v43 = vld [vmem:[%s3830_s10 + $0x150] ss:$24 sps:$4 sm:$0xff]   ;;  %v2917_v45 = vld [vmem:[%s3830_s10 + $0x14] ss:$24 sps:$4 sm:$0xff]   ;;  %v3920_v53 = vshrl.u32 %v635_v50, 7  ;;  %v3374_v19 = vmov 0.0  }
 0x124   : > { %942 = vmatprep.subr.bf16.mxu0 %v2885_v24  ;;  %985 = vmatprep.subr.bf16.mxu1 %v2888_v26  ;;  %v3924_v55 = vld [vmem:[%s3864_s15] sm:$0xf]  ;;  %v2920_v5 = vld [vmem:[%s3830_s10 + $0x44] ss:$24 sps:$4 sm:$0xff]   ;;  %v2918_v6 = vld [vmem:[%s3830_s10 + $0x40] ss:$24 sps:$4 sm:$0xff]  }
 0x125   : > { %v637_v54 = vsub.s32 0, %v3920_v53  ;;  %v643_v59 = vsub.s32 1, %v3920_v53  ;;  %v2923_v7 = vld [vmem:[%s3830_s10 + $0x74] ss:$24 sps:$4 sm:$0xff]   ;;  %v2921_v8 = vld [vmem:[%s3830_s10 + $0x70] ss:$24 sps:$4 sm:$0xff]  }
 0x126   : > { %v2926_v9 = vld [vmem:[%s3830_s10 + $0xa4] ss:$24 sps:$4 sm:$0xff]   ;;  %v2924_v10 = vld [vmem:[%s3830_s10 + $0xa0] ss:$24 sps:$4 sm:$0xff]   ;;  %vm1125_vm1 = vcmask 523264   ;;  %s3376_s0 = smov 64  }
 0x127   : > { %943 = vmatpush1.bf16.msra.mxu0 %v2887_v25  ;;  %986 = vmatpush1.bf16.msra.mxu1 %v2890_v27  ;;  %v638_v58 = vrot.slane %v3924_v55, %v637_v54  ;;  %v644_v63 = vrot.slane %v3924_v55, %v643_v59  ;;  %vm1314_vm2 = vcmask 130048  }
 0x128   : > { %944 = vmatprep.subr.bf16.mxu0 %v2891_v28  ;;  %987 = vmatprep.subr.bf16.mxu1 %v2894_v30 }
 0x12b   : > { %945 = vmatpush1.bf16.msra.mxu0 %v2893_v29  ;;  %988 = vmatpush1.bf16.msra.mxu1 %v2896_v31 }
 0x12c   : > { %946 = vmatprep.subr.bf16.mxu0 %v2897_v32  ;;  %989 = vmatprep.subr.bf16.mxu1 %v2900_v33 }
 0x12f   : > { %947 = vmatpush1.bf16.msra.mxu0 %v2899_v34  ;;  %990 = vmatpush1.bf16.msra.mxu1 %v2902_v35 }
 0x130   : > { %948 = vmatprep.subr.bf16.mxu0 %v2903_v36  ;;  %991 = vmatprep.subr.bf16.mxu1 %v2906_v37 }
 0x133   : > { %949 = vmatpush1.bf16.msra.mxu0 %v2905_v39  ;;  %992 = vmatpush1.bf16.msra.mxu1 %v2908_v40 }
 0x134   : > { %950 = vmatprep.subr.bf16.mxu0 %v2909_v41  ;;  %993 = vmatprep.subr.bf16.mxu1 %v2912_v42 }
 0x137   : > { %951 = vmatpush1.bf16.msra.mxu0 %v2911_v43  ;;  %994 = vmatpush1.bf16.msra.mxu1 %v2914_v44 }
 0x138   : > { %1022 = vmatprep.subr.bf16.mxu0 %v2917_v45  ;;  %2637 = vmatprep.subr.bf16.mxu1 %v3374_v19 }
 0x1a6   : > { %v613_v11 = vpop.xlane.xlu0 %612 }
 0x1a7   : > { %v617_v12 = vmul.f32 0.0078125, %v613_v11  ;;  %v2929_v11 = vld [vmem:[%s3830_s10 + $0xd4] ss:$24 sps:$4 sm:$0xff]  }
 0x1a9   : > { %v3884_v13 = vsub.f32 %v609_v2, %v617_v12  ;;  %v2927_v12 = vld [vmem:[%s3830_s10 + $0xd0] ss:$24 sps:$4 sm:$0xff]  }
 0x1aa   : > { %v615_v14 = vpop.xlane.xlu0 %614 }
 0x1ab   : > { %v618_v15 = vmul.f32 0.0078125, %v615_v14  ;;  %v621_v16 = vmul.f32 %v3884_v13, %v3884_v13  ;;  %v2930_v14 = vld [vmem:[%s3830_s10 + $0x100] ss:$24 sps:$4 sm:$0xff]  }
 0x1ad   : > { %v3888_v17 = vsub.f32 %v610_v3, %v618_v15  ;;  %623 = vadd.xlane.f32.xlu1 %v621_v16  ;;  %v2915_v3 = vld [vmem:[%s3830_s10 + $0x10] ss:$24 sps:$4 sm:$0xff]   ;;  %v2935_v15 = vld [vmem:[%s3830_s10 + $0x134] ss:$24 sps:$4 sm:$0xff]  }
 0x1ae   : > { %v2933_v16 = vld [vmem:[%s3830_s10 + $0x130] ss:$24 sps:$4 sm:$0xff]  }
 0x1af   : > { %v622_v18 = vmul.f32 %v3888_v17, %v3888_v17 }
 0x1b1   : > { %625 = vadd.xlane.f32.xlu1 %v622_v18  ;;  %v2936_v18 = vld [vmem:[%s3830_s10 + $0x160] ss:$24 sps:$4 sm:$0xff]  }
 0x23a   : > { %v624_v46 = vpop.xlane.xlu1 %623 }
 0x23b   : > { %v627_v47 = vmul.f32 0.0078125, %v624_v46 }
 0x23d   : > { %v629_v48 = vadd.f32 1e-05, %v627_v47 }
 0x23e   : > { %v626_v49 = vpop.xlane.xlu1 %625 }
 0x23f   : > { %2995 = vrsqrt.f32 %v629_v48  ;;  %v628_v51 = vmul.f32 0.0078125, %v626_v49 }
 0x241   : > { %v630_v52 = vadd.f32 1e-05, %v628_v51 }
 0x243   : > { %2997 = vrsqrt.f32 %v630_v52 }
 0x249   : > { %v2996_v56 = vpop.eup %2995 }
 0x24a   : > { %v633_v57 = vmul.f32 %v2996_v56, %v3884_v13  ;;  %v2932_v13 = vld [vmem:[%s3830_s10 + $0x104] ss:$24 sps:$4 sm:$0xff]  }
 0x24c   : > { %v639_v62 = vmul.f32 %v638_v58, %v633_v57 }
 0x24d   : > { %v2998_v60 = vpop.eup %2997 }
 0x24e   : > { %v634_v61 = vmul.f32 %v2998_v60, %v3888_v17  ;;  %v645_v1 = vadd.f32 %v644_v63, %v639_v62  ;;  %v2938_v17 = vld [vmem:[%s3830_s10 + $0x164] ss:$24 sps:$4 sm:$0xff]  }
 0x250   : > { %v640_v0 = vmul.f32 %v638_v58, %v634_v61 }
 0x252   : > { %v646_v2 = vadd.f32 %v644_v63, %v640_v0 }
 0x254   : > { %v647_v4 = vpack.c.bf16 %v646_v2, %v645_v1 }
 0x256   : > { %969 = vmatmul.mubr.bf16.vlgmr.msra.gmra.mrb[0].mxu0 %v647_v4  ;;  %1012 = vmatmul.mubr.bf16.vlgmr.msra.gmra.mrb[0].mxu1 %v647_v4 }
 0x257   : > { %1023 = vmatpush1.bf16.msra.mxu0 %v2915_v3  ;;  %1054 = vmatprep.mubr.bf16.mxu0 %v3373_v38 }
 0x258   : > { %1024 = vmatprep.subr.bf16.mxu0 %v2920_v5  ;;  %2639 = vmatprep.mubr.msk.bf16.mxu1 %vm3375_vm0, %v3374_v19 }
 0x25b   : > { %1025 = vmatpush1.bf16.msra.mxu0 %v2918_v6 }
 0x25c   : > { %1026 = vmatprep.subr.bf16.mxu0 %v2923_v7 }
 0x25f   : > { %1027 = vmatpush1.bf16.msra.mxu0 %v2921_v8 }
 0x260   : > { %1028 = vmatprep.subr.bf16.mxu0 %v2926_v9 }
 0x263   : > { %1029 = vmatpush1.bf16.msra.mxu0 %v2924_v10 }
 0x264   : > { %1030 = vmatprep.subr.bf16.mxu0 %v2929_v11 }
 0x267   : > { %1031 = vmatpush1.bf16.msra.mxu0 %v2927_v12 }
 0x268   : > { %1032 = vmatprep.subr.bf16.mxu0 %v2932_v13 }
 0x26b   : > { %1033 = vmatpush1.bf16.msra.mxu0 %v2930_v14 }
 0x26c   : > { %1034 = vmatprep.subr.bf16.mxu0 %v2935_v15 }
 0x26f   : > { %1035 = vmatpush1.bf16.msra.mxu0 %v2933_v16 }
 0x270   : > { %1036 = vmatprep.subr.bf16.mxu0 %v2938_v17 }
 0x273   : > { %1037 = vmatpush1.bf16.msra.mxu0 %v2936_v18 }
 0x276   : > { %1055 = vmatmul.mubr.bf16.vlgmr.msra.gmra.mrb[4].mxu0 %v647_v4 }
 0x329   : > { %v970_v20 = vpop.f32.mrb[0].mxu0  ;;  %v1013_v21 = vpop.f32.mrb[0].mxu1 }
 0x32a   : > { %v972_v22 = vpop.f32.mrb[1].mxu0  ;;  %v1015_v23 = vpop.f32.mrb[1].mxu1 }
 0x32b   : > { %v974_v24 = vpop.f32.mrb[2].mxu0  ;;  %v1017_v25 = vpop.f32.mrb[2].mxu1 }
 0x32c   : > { %v2832_v26 = vpack.i.bf16 %v974_v24, %v970_v20  ;;  %v1081_v27 = vpack.c.bf16 %v974_v24, %v970_v20  ;;  %v2827_v28 = vpack.i.bf16 %v1017_v25, %v1013_v21  ;;  %v1101_v29 = vpack.c.bf16 %v1017_v25, %v1013_v21  ;;  %v976_v30 = vpop.f32.mrb[3].mxu0  ;;  %v1019_v31 = vpop.f32.mrb[3].mxu1 }
 0x32d   : > { %v2842_v32 = vpack.i.bf16 %v976_v30, %v972_v22  ;;  %v1083_v33 = vpack.c.bf16 %v976_v30, %v972_v22  ;;  %v2837_v34 = vpack.i.bf16 %v1019_v31, %v1015_v23  ;;  %v1103_v35 = vpack.c.bf16 %v1019_v31, %v1015_v23 }
 0x32e   : > { %2828 = vrot.lane.b32.xlu0 %v2827_v28, %s3376_s0  ;;  %2833 = vrot.lane.b32.xlu1 %v2832_v26, %s3376_s0  ;;  %v1130_v36 = vsel %vm1125_vm1, %v1101_v29, 0 }
 0x32f   : > { %2638 = vmatpush3.bf16.xpose.msra.mxu1 %v1130_v36  ;;  %v1224_v62 = vsel %vm1125_vm1, %v1103_v35, 0 }
 0x330   : > { %2643 = vmatprep.subr.bf16.mxu1 %v3374_v19 }
 0x332   : > { %2838 = vrot.lane.b32.xlu1 %v2837_v34, %s3376_s0 }
 0x336   : > { %2640 = vmatmul.mubr.msk.bf16.vlgmr.msra.gmra.mrb[4].mxu1 %vm1125_vm1, %v1081_v27  ;;  %2843 = vrot.lane.b32.xlu1 %v2842_v32, %s3376_s0 }
 0x337   : > { %2645 = vmatprep.mubr.msk.bf16.mxu1 %vm3375_vm0, %v3374_v19 }
 0x349   : > { %v3963_v37 = vpop.f32.mrb[4].mxu0 }
 0x34a   : > { %v3965_v39 = vpop.f32.mrb[5].mxu0 }
 0x34b   : > { %v3967_v40 = vpop.f32.mrb[6].mxu0 }
 0x34c   : > { %v2847_v41 = vpack.i.bf16 %v3967_v40, %v3963_v37  ;;  %v1121_v42 = vpack.c.bf16 %v3967_v40, %v3963_v37  ;;  %v3973_v43 = vpop.f32.mrb[7].mxu0 }
 0x34d   : > { %v2852_v44 = vpack.i.bf16 %v3973_v43, %v3965_v39  ;;  %v1123_v45 = vpack.c.bf16 %v3973_v43, %v3965_v39 }
 0x3a0   : > { %v2829_v46 = vpop.permute.xlu0 %2828  ;;  %v2834_v50 = vpop.permute.xlu1 %2833 }
 0x3a1   : > { %v2831_v47 = vunpack.i.h.bf16 %v2829_v46  ;;  %v2830_v48 = vunpack.i.l.bf16 %v2829_v46  ;;  %v2836_v52 = vunpack.i.h.bf16 %v2834_v50  ;;  %v2835_v56 = vunpack.i.l.bf16 %v2834_v50 }
 0x3a3   : > { %v1102_v49 = vpack.c.bf16 %v2831_v47, %v2830_v48  ;;  %v1082_v58 = vpack.c.bf16 %v2836_v52, %v2835_v56 }
 0x3a4   : > { %v2839_v57 = vpop.permute.xlu1 %2838 }
 0x3a5   : > { %v1177_v51 = vsel %vm1125_vm1, %v1102_v49, 0  ;;  %v2841_v60 = vunpack.i.h.bf16 %v2839_v57  ;;  %v2840_v61 = vunpack.i.l.bf16 %v2839_v57 }
 0x3a6   : > { %2644 = vmatpush3.bf16.xpose.msra.mxu1 %v1177_v51 }
 0x3a7   : > { %2649 = vmatprep.subr.bf16.mxu1 %v3374_v19  ;;  %v1104_v63 = vpack.c.bf16 %v2841_v60, %v2840_v61 }
 0x3a8   : > { %v2844_v0 = vpop.permute.xlu1 %2843 }
 0x3a9   : > { %v1271_v1 = vsel %vm1125_vm1, %v1104_v63, 0  ;;  %v2846_v2 = vunpack.i.h.bf16 %v2844_v0  ;;  %v2845_v3 = vunpack.i.l.bf16 %v2844_v0 }
 0x3ab   : > { %v1084_v4 = vpack.c.bf16 %v2846_v2, %v2845_v3 }
 0x3ad   : > { %2646 = vmatmul.mubr.msk.bf16.vlgmr.msra.gmra.mrb[8].mxu1 %vm1125_vm1, %v1082_v58 }
 0x3ae   : > { %2650 = vmatpush3.bf16.xpose.msra.mxu1 %v1224_v62  ;;  %2651 = vmatprep.mubr.msk.bf16.mxu1 %vm3375_vm0, %v3374_v19 }
 0x3af   : > { %2655 = vmatprep.subr.bf16.mxu1 %v3374_v19 }
 0x3b5   : > { %2652 = vmatmul.mubr.msk.bf16.vlgmr.msra.gmra.mrb[12].mxu1 %vm1125_vm1, %v1083_v33 }
 0x3b6   : > { %2656 = vmatpush3.bf16.xpose.msra.mxu1 %v1271_v1  ;;  %2657 = vmatprep.mubr.msk.bf16.mxu1 %vm3375_vm0, %v3374_v19 }
 0x3b7   : > { %2661 = vmatprep.subr.bf16.mxu1 %v3374_v19 }
 0x3bd   : > { %2658 = vmatmul.mubr.msk.bf16.vlgmr.msra.gmra.mrb[16].mxu1 %vm1125_vm1, %v1084_v4 }
 0x3be   : > { %2662 = vmatpush3.bf16.msra.mxu1 %v1121_v42  ;;  %2663 = vmatprep.mubr.msk.bf16.mxu1 %vm3375_vm0, %v3374_v19 }
 0x3bf   : > { %2667 = vmatprep.subr.bf16.mxu1 %v3374_v19 }
 0x409   : > { %v1166_v5 = vpop.f32.mrb[4].mxu1 }
 0x40a   : > { %v2641_v6 = vpop.f32.mrb[5].mxu1  ;;  %v1315_v7 = vsel %vm1314_vm2, %v1166_v5, -inf }
 0x40b   : > { %1316 = vmax.xlane.f32.xlu0 %v1315_v7  ;;  %v1169_v8 = vpop.f32.mrb[6].mxu1 }
 0x40c   : > { %v2642_v9 = vpop.f32.mrb[7].mxu1  ;;  %v1318_v10 = vsel %vm1314_vm2, %v1169_v8, -inf }
 0x40d   : > { %1319 = vmax.xlane.f32.xlu1 %v1318_v10 }
 0x480   : > { %v1213_v11 = vpop.f32.mrb[8].mxu1 }
 0x481   : > { %v2647_v12 = vpop.f32.mrb[9].mxu1  ;;  %v1321_v13 = vsel %vm1314_vm2, %v1213_v11, -inf }
 0x482   : > { %1322 = vmax.xlane.f32.xlu0 %v1321_v13  ;;  %v1216_v14 = vpop.f32.mrb[10].mxu1 }
 0x483   : > { %v2648_v15 = vpop.f32.mrb[11].mxu1  ;;  %v1324_v16 = vsel %vm1314_vm2, %v1216_v14, -inf }
 0x486   : > { %1325 = vmax.xlane.f32.xlu0 %v1324_v16 }
 0x488   : > { %v1260_v17 = vpop.f32.mrb[12].mxu1 }
 0x489   : > { %v2653_v18 = vpop.f32.mrb[13].mxu1  ;;  %v1327_v20 = vsel %vm1314_vm2, %v1260_v17, -inf }
 0x48a   : > { %1328 = vmax.xlane.f32.xlu0 %v1327_v20  ;;  %v1263_v21 = vpop.f32.mrb[14].mxu1 }
 0x48b   : > { %v2654_v22 = vpop.f32.mrb[15].mxu1  ;;  %v1330_v23 = vsel %vm1314_vm2, %v1263_v21, -inf }
 0x48c   : > { %1331 = vmax.xlane.f32.xlu1 %v1330_v23 }
 0x490   : > { %v1307_v24 = vpop.f32.mrb[16].mxu1 }
 0x491   : > { %v2659_v25 = vpop.f32.mrb[17].mxu1  ;;  %v1333_v26 = vsel %vm1314_vm2, %v1307_v24, -inf }
 0x492   : > { %1334 = vmax.xlane.f32.xlu0 %v1333_v26  ;;  %v1310_v27 = vpop.f32.mrb[18].mxu1 }
 0x493   : > { %v2660_v28 = vpop.f32.mrb[19].mxu1  ;;  %v1336_v29 = vsel %vm1314_vm2, %v1310_v27, -inf }
 0x494   : > { %1337 = vmax.xlane.f32.xlu1 %v1336_v29 }
 0x498   : > { %v1317_v30 = vpop.xlane.xlu0 %1316 }
 0x499   : > { %v1339_v31 = vsub.f32 %v1166_v5, %v1317_v30 }
 0x49a   : > { %v1320_v32 = vpop.xlane.xlu1 %1319 }
 0x49b   : > { %v1347_v33 = vmul.f32 1.442695, %v1339_v31  ;;  %v1340_v34 = vsub.f32 %v1169_v8, %v1320_v32 }
 0x49d   : > { %2999 = vpow2.f32 %v1347_v33  ;;  %v1349_v35 = vmul.f32 1.442695, %v1340_v34 }
 0x49f   : > { %3001 = vpow2.f32 %v1349_v35 }
 0x4a7   : > { %v3000_v36 = vpop.eup %2999 }
 0x4a8   : > { %v1363_v42 = vsel %vm1314_vm2, %v3000_v36, 0.0 }
 0x4a9   : > { %v3002_v46 = vpop.eup %3001  ;;  %1364 = vadd.xlane.f32.xlu0 %v1363_v42 }
 0x4aa   : > { %v1366_v47 = vsel %vm1314_vm2, %v3002_v46, 0.0 }
 0x4ab   : > { %1367 = vadd.xlane.f32.xlu1 %v1366_v47 }
 0x50f   : > { %v1323_v48 = vpop.xlane.xlu0 %1322 }
 0x510   : > { %v1341_v49 = vsub.f32 %v1213_v11, %v1323_v48 }
 0x512   : > { %v1351_v50 = vmul.f32 1.442695, %v1341_v49 }
 0x513   : > { %v1326_v51 = vpop.xlane.xlu0 %1325 }
 0x514   : > { %3003 = vpow2.f32 %v1351_v50  ;;  %v1342_v52 = vsub.f32 %v1216_v14, %v1326_v51 }
 0x516   : > { %v1353_v56 = vmul.f32 1.442695, %v1342_v52 }
 0x517   : > { %v1329_v57 = vpop.xlane.xlu0 %1328 }
 0x518   : > { %3005 = vpow2.f32 %v1353_v56  ;;  %v1343_v58 = vsub.f32 %v1260_v17, %v1329_v57 }
 0x519   : > { %v1332_v60 = vpop.xlane.xlu1 %1331 }
 0x51a   : > { %v1355_v61 = vmul.f32 1.442695, %v1343_v58  ;;  %v1344_v62 = vsub.f32 %v1263_v21, %v1332_v60 }
 0x51c   : > { %3007 = vpow2.f32 %v1355_v61  ;;  %v1357_v63 = vmul.f32 1.442695, %v1344_v62 }
 0x51e   : > { %v3004_v0 = vpop.eup %3003  ;;  %3009 = vpow2.f32 %v1357_v63 }
 0x51f   : > { %v1335_v1 = vpop.xlane.xlu0 %1334  ;;  %v1369_v2 = vsel %vm1314_vm2, %v3004_v0, 0.0 }
 0x520   : > { %v1345_v3 = vsub.f32 %v1307_v24, %v1335_v1  ;;  %1370 = vadd.xlane.f32.xlu0 %v1369_v2  ;;  %v2940_v1 = vld [vmem:[%s3836_s4] sm:$0xff]   ;;  %v2942_v2 = vld [vmem:[%s3836_s4 + $0x8] sm:$0xff]  }
 0x521   : > { %v1338_v4 = vpop.xlane.xlu1 %1337 }
 0x522   : > { %v3006_v5 = vpop.eup %3005  ;;  %v1359_v6 = vmul.f32 1.442695, %v1345_v3  ;;  %v1346_v7 = vsub.f32 %v1310_v27, %v1338_v4  ;;  %v2943_v3 = vld [vmem:[%s3836_s4 + $0x50] sm:$0xff]   ;;  %v2945_v4 = vld [vmem:[%s3836_s4 + $0x58] sm:$0xff]  }
 0x523   : > { %v1372_v8 = vsel %vm1314_vm2, %v3006_v5, 0.0 }
 0x524   : > { %3011 = vpow2.f32 %v1359_v6  ;;  %v1361_v9 = vmul.f32 1.442695, %v1346_v7  ;;  %1373 = vadd.xlane.f32.xlu1 %v1372_v8  ;;  %v2947_v6 = vld [vmem:[%s3836_s4 + $0x60] sm:$0xff]   ;;  %v2949_v8 = vld [vmem:[%s3836_s4 + $0x68] sm:$0xff]  }
 0x525   : > { %v2948_v7 = vld [vmem:[%s3836_s4 + $0x20] sm:$0xff]  }
 0x526   : > { %v3008_v10 = vpop.eup %3007  ;;  %3013 = vpow2.f32 %v1361_v9  ;;  %v2950_v9 = vld [vmem:[%s3836_s4 + $0x28] sm:$0xff]  }
 0x527   : > { %v1375_v11 = vsel %vm1314_vm2, %v3008_v10, 0.0 }
 0x528   : > { %v3010_v12 = vpop.eup %3009  ;;  %1376 = vadd.xlane.f32.xlu0 %v1375_v11 }
 0x529   : > { %v1378_v13 = vsel %vm1314_vm2, %v3010_v12, 0.0 }
 0x52a   : > { %1379 = vadd.xlane.f32.xlu1 %v1378_v13 }
 0x52e   : > { %v3012_v14 = vpop.eup %3011 }
 0x52f   : > { %v1381_v15 = vsel %vm1314_vm2, %v3012_v14, 0.0 }
 0x530   : > { %v3014_v16 = vpop.eup %3013  ;;  %1382 = vadd.xlane.f32.xlu0 %v1381_v15 }
 0x531   : > { %v1384_v17 = vsel %vm1314_vm2, %v3014_v16, 0.0 }
 0x532   : > { %1385 = vadd.xlane.f32.xlu1 %v1384_v17  ;;  %v2952_v17 = vld [vmem:[%s3836_s4 + $0x30] sm:$0xff]  }
 0x536   : > { %v1365_v18 = vpop.xlane.xlu0 %1364 }
 0x537   : > { %3015 = vrcp.f32 %v1365_v18 }
 0x538   : > { %v1368_v20 = vpop.xlane.xlu1 %1367 }
 0x539   : > { %3017 = vrcp.f32 %v1368_v20 }
 0x541   : > { %v3016_v21 = vpop.eup %3015 }
 0x542   : > { %v1395_v23 = vmul.f32 %v3016_v21, %v3000_v36 }
 0x543   : > { %v3018_v22 = vpop.eup %3017  ;;  %2853 = vrot.lane.b32.xlu1 %v2852_v44, %s3376_s0 }
 0x544   : > { %v1396_v24 = vmul.f32 %v3018_v22, %v3002_v46  ;;  %v2953_v22 = vld [vmem:[%s3836_s4 + $0x78] sm:$0xff]  }
 0x546   : > { %2848 = vrot.lane.b32.xlu0 %v2847_v41, %s3376_s0  ;;  %v1403_v25 = vpack.c.bf16 %v1396_v24, %v1395_v23  ;;  %v2954_v23 = vld [vmem:[%s3836_s4 + $0x38] sm:$0xff]  }
 0x548   : > { %2664 = vmatmul.mubr.msk.bf16.vlgmr.msra.gmra.mrb[20].mxu1 %vm1314_vm2, %v1403_v25 }
 0x549   : > { %2669 = vmatprep.mubr.msk.bf16.mxu1 %vm3375_vm0, %v3374_v19 }
 0x5ad   : > { %v1371_v27 = vpop.xlane.xlu0 %1370 }
 0x5b1   : > { %v1374_v26 = vpop.xlane.xlu1 %1373 }
 0x5b2   : > { %3019 = vrcp.f32 %v1374_v26 }
 0x5b3   : > { %3021 = vrcp.f32 %v1371_v27 }
 0x5b5   : > { %v1377_v28 = vpop.xlane.xlu0 %1376 }
 0x5b7   : > { %v1380_v29 = vpop.xlane.xlu1 %1379 }
 0x5b8   : > { %3023 = vrcp.f32 %v1380_v29 }
 0x5b9   : > { %3025 = vrcp.f32 %v1377_v28 }
 0x5bc   : > { %v3020_v30 = vpop.eup %3019 }
 0x5bd   : > { %v1383_v44 = vpop.xlane.xlu0 %1382  ;;  %v3022_v32 = vpop.eup %3021  ;;  %v1398_v41 = vmul.f32 %v3020_v30, %v3006_v5  ;;  %v2946_v5 = vld [vmem:[%s3836_s4 + $0x18] sm:$0xff]  }
 0x5be   : > { %v1397_v35 = vmul.f32 %v3022_v32, %v3004_v0  ;;  %v2939_v0 = vld [vmem:[%s3836_s4 + $0x40] sm:$0xff]  }
 0x5bf   : > { %v1386_v33 = vpop.xlane.xlu1 %1385  ;;  %2593 = vmatprep.subr.bf16.mxu0 %v2939_v0 }
 0x5c0   : > { %3027 = vrcp.f32 %v1386_v33  ;;  %v1404_v36 = vpack.c.bf16 %v1398_v41, %v1397_v35  ;;  %2594 = vmatpush3.bf16.msra.mxu0 %v2940_v1 }
 0x5c1   : > { %v2849_v31 = vpop.permute.xlu0 %2848  ;;  %3029 = vrcp.f32 %v1383_v44 }
 0x5c2   : > { %v2851_v37 = vunpack.i.h.bf16 %v2849_v31  ;;  %v2850_v40 = vunpack.i.l.bf16 %v2849_v31  ;;  %v3024_v42 = vpop.eup %3023 }
 0x5c3   : > { %v2854_v46 = vpop.permute.xlu1 %2853  ;;  %v3026_v47 = vpop.eup %3025  ;;  %v1400_v48 = vmul.f32 %v3024_v42, %v3010_v12 }
 0x5c4   : > { %v1122_v34 = vpack.c.bf16 %v2851_v37, %v2850_v40  ;;  %v2856_v49 = vunpack.i.h.bf16 %v2854_v46  ;;  %v2855_v50 = vunpack.i.l.bf16 %v2854_v46  ;;  %v1399_v51 = vmul.f32 %v3026_v47, %v3008_v10  ;;  %v2515_v46 = vld [vmem:[%s596_s5] ss:$0 sm:$0xff] }
 0x5c6   : > { %2668 = vmatpush3.bf16.msra.mxu1 %v1122_v34  ;;  %v1405_v52 = vpack.c.bf16 %v1400_v48, %v1399_v51  ;;  %v1124_v57 = vpack.c.bf16 %v2856_v49, %v2855_v50 }
 0x5c7   : > { %2673 = vmatprep.subr.bf16.mxu1 %v3374_v19 }
 0x5c9   : > { %2670 = vmatmul.mubr.msk.bf16.vlgmr.msra.gmra.mrb[24].mxu1 %vm1314_vm2, %v1404_v36 }
 0x5ca   : > { %2674 = vmatpush3.bf16.msra.mxu1 %v1123_v45  ;;  %2675 = vmatprep.mubr.msk.bf16.mxu1 %vm3375_vm0, %v3374_v19  ;;  %v3028_v56 = vpop.eup %3027 }
 0x5cb   : > { %2679 = vmatprep.subr.bf16.mxu1 %v3374_v19  ;;  %v3030_v58 = vpop.eup %3029  ;;  %v1402_v39 = vmul.f32 %v3028_v56, %v3014_v16  ;;  %v2951_v16 = vld [vmem:[%s3836_s4 + $0x70] sm:$0xff]  }
 0x5cc   : > { %v1401_v43 = vmul.f32 %v3030_v58, %v3012_v14 }
 0x5ce   : > { %v1406_v45 = vpack.c.bf16 %v1402_v39, %v1401_v43  ;;  %v3044_v39 = vld [vmem:[#allocation2 + $0x8] sm:$0xff] }
 0x5d1   : > { %2676 = vmatmul.mubr.msk.bf16.vlgmr.msra.gmra.mrb[28].mxu1 %vm1314_vm2, %v1405_v52 }
 0x5d2   : > { %2680 = vmatpush3.bf16.msra.mxu1 %v1124_v57  ;;  %2681 = vmatprep.mubr.msk.bf16.mxu1 %vm3375_vm0, %v3374_v19  ;;  %v2941_v19 = vld [vmem:[%s3836_s4 + $0x48] sm:$0xff]   ;;  %v3043_v57 = vld [vmem:[#allocation2] sm:$0xff] }
 0x5d3   : > { %2595 = vmatprep.subr.bf16.mxu0 %v2941_v19 }
 0x5d4   : > { %2596 = vmatpush3.bf16.msra.mxu0 %v2942_v2 }
 0x5d5   : > { %2597 = vmatprep.subr.bf16.mxu0 %v2943_v3 }
 0x5d9   : > { %2682 = vmatmul.mubr.msk.bf16.vlgmr.msra.gmra.mrb[32].mxu1 %vm1314_vm2, %v1406_v45  ;;  %v2955_v45 = vld [vmem:[%s3838_s28] ss:$8 sps:$4 sm:$0xff]  }
 0x5da   : > { %1958 = vmatprep.mubr.bf16.mxu1 %v3373_v38  ;;  %v2944_v38 = vld [vmem:[%s3836_s4 + $0x10] sm:$0xff]  }
 0x5db   : > { %2598 = vmatpush3.bf16.msra.mxu0 %v2944_v38 }
 0x5dc   : > { %2599 = vmatprep.subr.bf16.mxu0 %v2945_v4 }
 0x5df   : > { %2600 = vmatpush3.bf16.msra.mxu0 %v2946_v5  ;;  %v2963_v5 = vld [vmem:[%s3838_s28 + $0x24] ss:$8 sps:$4 sm:$0xff]  }
 0x5e0   : > { %2601 = vmatprep.subr.bf16.mxu0 %v2947_v6  ;;  %v2961_v6 = vld [vmem:[%s3838_s28 + $0x20] ss:$8 sps:$4 sm:$0xff]  }
 0x5e3   : > { %2602 = vmatpush3.bf16.msra.mxu0 %v2948_v7  ;;  %v2966_v7 = vld [vmem:[%s3838_s28 + $0x34] ss:$8 sps:$4 sm:$0xff]  }
 0x5e4   : > { %2603 = vmatprep.subr.bf16.mxu0 %v2949_v8  ;;  %v2964_v8 = vld [vmem:[%s3838_s28 + $0x30] ss:$8 sps:$4 sm:$0xff]  }
 0x5e7   : > { %2604 = vmatpush3.bf16.msra.mxu0 %v2950_v9  ;;  %v2969_v9 = vld [vmem:[%s3838_s28 + $0x44] ss:$8 sps:$4 sm:$0xff]  }
 0x5e8   : > { %2605 = vmatprep.subr.bf16.mxu0 %v2951_v16  ;;  %v2976_v16 = vld [vmem:[%s3838_s28 + $0x70] ss:$8 sps:$4 sm:$0xff]  }
 0x5eb   : > { %2606 = vmatpush3.bf16.msra.mxu0 %v2952_v17 }
 0x5ec   : > { %2607 = vmatprep.subr.bf16.mxu0 %v2953_v22 }
 0x5ef   : > { %2608 = vmatpush3.bf16.msra.mxu0 %v2954_v23 }
 0x61b   : > { %v4035_v60 = vpop.f32.mrb[20].mxu1 }
 0x61c   : > { %v2665_v61 = vpop.f32.mrb[21].mxu1 }
 0x61d   : > { %v1447_v62 = vpop.f32.mrb[22].mxu1  ;;  %v2960_v61 = vld [vmem:[%s3838_s28 + $0x14] ss:$8 sps:$4 sm:$0xff]  }
 0x61e   : > { %v2666_v63 = vpop.f32.mrb[23].mxu1 }
 0x69c   : > { %v1488_v10 = vpop.f32.mrb[24].mxu1 }
 0x69d   : > { %v2671_v11 = vpop.f32.mrb[25].mxu1 }
 0x69e   : > { %v1491_v12 = vpop.f32.mrb[26].mxu1  ;;  %v2972_v11 = vld [vmem:[%s3838_s28 + $0x54] ss:$8 sps:$4 sm:$0xff]  }
 0x69f   : > { %v2862_v13 = vpack.i.bf16 %v1491_v12, %v1488_v10  ;;  %v2672_v14 = vpop.f32.mrb[27].mxu1  ;;  %v2967_v10 = vld [vmem:[%s3838_s28 + $0x40] ss:$8 sps:$4 sm:$0xff]   ;;  %v2970_v12 = vld [vmem:[%s3838_s28 + $0x50] ss:$8 sps:$4 sm:$0xff]  }
 0x6a0   : > { %v2973_v14 = vld [vmem:[%s3838_s28 + $0x60] ss:$8 sps:$4 sm:$0xff]  }
 0x6a4   : > { %v1532_v15 = vpop.f32.mrb[28].mxu1 }
 0x6a5   : > { %v2677_v18 = vpop.f32.mrb[29].mxu1 }
 0x6a6   : > { %v1535_v20 = vpop.f32.mrb[30].mxu1 }
 0x6a7   : > { %v2678_v21 = vpop.f32.mrb[31].mxu1 }
 0x6ac   : > { %v1576_v24 = vpop.f32.mrb[32].mxu1 }
 0x6ad   : > { %v2683_v25 = vpop.f32.mrb[33].mxu1 }
 0x6ae   : > { %v1579_v26 = vpop.f32.mrb[34].mxu1 }
 0x6af   : > { %v2857_v27 = vpack.i.bf16 %v1579_v26, %v1576_v24  ;;  %v2684_v28 = vpop.f32.mrb[35].mxu1  ;;  %v1807_v24 = vsub.s32 2, %v3920_v53 }
 0x6b0   : > { %v1813_v28 = vsub.s32 3, %v3920_v53 }
 0x6b1   : > { %2858 = vrot.lane.b32.xlu1 %v2857_v27, %s3376_s0  ;;  %v1808_v27 = vrot.slane %v3924_v55, %v1807_v24 }
 0x6b5   : > { %2863 = vrot.lane.b32.xlu1 %v2862_v13, %s3376_s0  ;;  %v2975_v13 = vld [vmem:[%s3838_s28 + $0x64] ss:$8 sps:$4 sm:$0xff]  }
 0x723   : > { %v2859_v29 = vpop.permute.xlu1 %2858 }
 0x724   : > { %v2861_v44 = vunpack.i.h.bf16 %v2859_v29  ;;  %v2860_v30 = vunpack.i.l.bf16 %v2859_v29 }
 0x726   : > { %v1601_v31 = vsel %vm1125_vm1, %v1532_v15, %v2860_v30  ;;  %v1602_v32 = vsel %vm1125_vm1, %v1535_v20, %v2861_v44  ;;  %v2978_v15 = vld [vmem:[%s3838_s28 + $0x74] ss:$8 sps:$4 sm:$0xff]  }
 0x727   : > { %v2864_v37 = vpop.permute.xlu1 %2863  ;;  %v1604_v40 = vpack.c.bf16 %v1602_v32, %v1601_v31  ;;  %v1814_v31 = vrot.slane %v3924_v55, %v1813_v28  ;;  %v2983_v55 = vld [vmem:[%s3846_s18 + $0x50] sm:$0xff]  }
 0x728   : > { %v2866_v41 = vunpack.i.h.bf16 %v2864_v37  ;;  %v2865_v33 = vunpack.i.l.bf16 %v2864_v37 }
 0x729   : > { %1772 = vmatprep.mubr.bf16.mxu0 %v1604_v40 }
 0x72a   : > { %v1600_v34 = vsel %vm1125_vm1, %v1447_v62, %v2866_v41  ;;  %v1599_v35 = vsel %vm1125_vm1, %v4035_v60, %v2865_v33  ;;  %v2957_v60 = vld [vmem:[%s3838_s28 + $0x4] ss:$8 sps:$4 sm:$0xff]   ;;  %v2958_v62 = vld [vmem:[%s3838_s28 + $0x10] ss:$8 sps:$4 sm:$0xff]  }
 0x72b   : > { %v1603_v36 = vpack.c.bf16 %v1600_v34, %v1599_v35  ;;  %1926 = vmatprep.subr.bf16.mxu1 %v2957_v60  ;;  %v2979_v33 = vld [vmem:[%s3846_s18 + $0x40] sm:$0xff]   ;;  %v2981_v35 = vld [vmem:[%s3846_s18 + $0x48] sm:$0xff]  }
 0x72c   : > { %1927 = vmatpush1.bf16.msra.mxu1 %v2955_v45  ;;  %v2980_v34 = vld [vmem:[%s3846_s18] sm:$0xff]   ;;  %2615 = vmatprep.subr.bf16.mxu0 %v2979_v33  ;;  %v1834_v45 = vld [vmem:[%s3844_s9] sm:$0x3]  ;;  %s4291_s9 = sld [smem:[#allocation22_spill]] }
 0x72d   : > { %1773 = vmatmul.mubr.bf16.vlgmr.msra.gmra.mrb[8].mxu0 %v1603_v36  ;;  %1928 = vmatprep.subr.bf16.mxu1 %v2960_v61  ;;  %v2982_v36 = vld [vmem:[%s3846_s18 + $0x8] sm:$0xff]   ;;  %v1839_v60 = vrot.slane %v1834_v45, %v637_v54  ;;  %v1843_v61 = vrot.slane %v1834_v45, %v643_v59 }
 0x72e   : > { %2616 = vmatpush3.bf16.msra.mxu0 %v2980_v34 }
 0x72f   : > { %2617 = vmatprep.subr.bf16.mxu0 %v2981_v35 }
 0x730   : > { %1929 = vmatpush1.bf16.msra.mxu1 %v2958_v62 }
 0x731   : > { %1930 = vmatprep.subr.bf16.mxu1 %v2963_v5 }
 0x732   : > { %2618 = vmatpush3.bf16.msra.mxu0 %v2982_v36  ;;  %p2565_p0 = scmp.ne.s32.totalorder %s4291_s9, 1 }
 0x733   : > { %2619 = vmatprep.subr.bf16.mxu0 %v2983_v55  ;;  %v2548_v55 = vld [vmem:[%s599_s3] ss:$0 sm:$0xff] }
 0x734   : > { %1931 = vmatpush1.bf16.msra.mxu1 %v2961_v6 }
 0x735   : > { %1932 = vmatprep.subr.bf16.mxu1 %v2966_v7 }
 0x738   : > { %1933 = vmatpush1.bf16.msra.mxu1 %v2964_v8 }
 0x739   : > { %1934 = vmatprep.subr.bf16.mxu1 %v2969_v9 }
 0x73c   : > { %1935 = vmatpush1.bf16.msra.mxu1 %v2967_v10 }
 0x73d   : > { %1936 = vmatprep.subr.bf16.mxu1 %v2972_v11 }
 0x740   : > { %1937 = vmatpush1.bf16.msra.mxu1 %v2970_v12 }
 0x741   : > { %1938 = vmatprep.subr.bf16.mxu1 %v2975_v13 }
 0x744   : > { %1939 = vmatpush1.bf16.msra.mxu1 %v2973_v14 }
 0x745   : > { %1940 = vmatprep.subr.bf16.mxu1 %v2978_v15 }
 0x748   : > { %1941 = vmatpush1.bf16.msra.mxu1 %v2976_v16 }
 0x800   : > { %v2609_v42 = vpop.f32.mrb[8].mxu0 }
 0x801   : > { %v2610_v47 = vpop.f32.mrb[9].mxu0 }
 0x802   : > { %v2611_v48 = vadd.f32 %v2610_v47, %v2609_v42  ;;  %v2612_v49 = vpop.f32.mrb[10].mxu0  ;;  %v2984_v42 = vld [vmem:[%s3846_s18 + $0x10] sm:$0xff]   ;;  %v2986_v47 = vld [vmem:[%s3846_s18 + $0x18] sm:$0xff]  }
 0x803   : > { %v2613_v50 = vpop.f32.mrb[11].mxu0  ;;  %2620 = vmatpush3.bf16.msra.mxu0 %v2984_v42 }
 0x804   : > { %v1775_v51 = vadd.f32 %v2611_v48, %v2515_v46  ;;  %v2614_v52 = vadd.f32 %v2613_v50, %v2612_v49  ;;  %v2987_v48 = vld [vmem:[%s3846_s18 + $0x60] sm:$0xff]   ;;  %v2989_v50 = vld [vmem:[%s3846_s18 + $0x68] sm:$0xff]  }
 0x805   : > { %v2988_v49 = vld [vmem:[%s3846_s18 + $0x20] sm:$0xff]  }
 0x806   : > { %v1778_v56 = vadd.f32 %v2614_v52, %v2515_v46  ;;  %v4065_v58 = vadd.f32 %v3043_v57, %v1775_v51  ;;  %v2985_v46 = vld [vmem:[%s3846_s18 + $0x58] sm:$0xff]   ;;  %v2990_v51 = vld [vmem:[%s3846_s18 + $0x28] sm:$0xff]   ;;  %v2991_v52 = vld [vmem:[%s3846_s18 + $0x70] sm:$0xff]  }
 0x807   : > { %2621 = vmatprep.subr.bf16.mxu0 %v2985_v46  ;;  %v2993_v57 = vld [vmem:[%s3846_s18 + $0x78] sm:$0xff]  }
 0x808   : > { %1783 = vadd.xlane.f32.xlu0 %v4065_v58  ;;  %v4068_v43 = vadd.f32 %v3044_v39, %v1778_v56  ;;  %2622 = vmatpush3.bf16.msra.mxu0 %v2986_v47  ;;  %v2992_v56 = vld [vmem:[%s3846_s18 + $0x30] sm:$0xff]   ;;  %v2994_v39 = vld [vmem:[%s3846_s18 + $0x38] sm:$0xff]  }
 0x809   : > { %2623 = vmatprep.subr.bf16.mxu0 %v2987_v48 }
 0x80a   : > { %1785 = vadd.xlane.f32.xlu1 %v4068_v43 }
 0x80c   : > { %2624 = vmatpush3.bf16.msra.mxu0 %v2988_v49 }
 0x80d   : > { %2625 = vmatprep.subr.bf16.mxu0 %v2989_v50 }
 0x810   : > { %2626 = vmatpush3.bf16.msra.mxu0 %v2990_v51 }
 0x811   : > { %2627 = vmatprep.subr.bf16.mxu0 %v2991_v52 }
 0x814   : > { %2628 = vmatpush3.bf16.msra.mxu0 %v2992_v56 }
 0x815   : > { %2629 = vmatprep.subr.bf16.mxu0 %v2993_v57 }
 0x818   : > { %2630 = vmatpush3.bf16.msra.mxu0 %v2994_v39 }
 0x895   : > { %v1784_v63 = vpop.xlane.xlu0 %1783 }
 0x896   : > { %v1787_v0 = vmul.f32 0.0078125, %v1784_v63 }
 0x897   : > { %v1786_v1 = vpop.xlane.xlu1 %1785 }
 0x898   : > { %v1789_v19 = vsub.f32 %v4065_v58, %v1787_v0  ;;  %v1788_v2 = vmul.f32 0.0078125, %v1786_v1 }
 0x89a   : > { %v1790_v3 = vsub.f32 %v4068_v43, %v1788_v2  ;;  %v1791_v38 = vmul.f32 %v1789_v19, %v1789_v19 }
 0x89c   : > { %1793 = vadd.xlane.f32.xlu0 %v1791_v38  ;;  %v1792_v4 = vmul.f32 %v1790_v3, %v1790_v3 }
 0x8a0   : > { %1795 = vadd.xlane.f32.xlu0 %v1792_v4 }
 0x929   : > { %v1794_v17 = vpop.xlane.xlu0 %1793 }
 0x92a   : > { %v1797_v18 = vmul.f32 0.0078125, %v1794_v17 }
 0x92c   : > { %v1799_v20 = vadd.f32 1e-05, %v1797_v18 }
 0x92d   : > { %v1796_v21 = vpop.xlane.xlu0 %1795 }
 0x92e   : > { %3031 = vrsqrt.f32 %v1799_v20  ;;  %v1798_v22 = vmul.f32 0.0078125, %v1796_v21 }
 0x930   : > { %v1800_v23 = vadd.f32 1e-05, %v1798_v22 }
 0x932   : > { %3033 = vrsqrt.f32 %v1800_v23 }
 0x938   : > { %v3032_v25 = vpop.eup %3031 }
 0x939   : > { %v1803_v26 = vmul.f32 %v3032_v25, %v1789_v19 }
 0x93b   : > { %v1809_v30 = vmul.f32 %v1808_v27, %v1803_v26 }
 0x93c   : > { %v3034_v29 = vpop.eup %3033 }
 0x93d   : > { %v1804_v44 = vmul.f32 %v3034_v29, %v1790_v3  ;;  %v1815_v37 = vadd.f32 %v1814_v31, %v1809_v30 }
 0x93f   : > { %v1810_v32 = vmul.f32 %v1808_v27, %v1804_v44 }
 0x941   : > { %v1816_v40 = vadd.f32 %v1814_v31, %v1810_v32 }
 0x943   : > { %v1817_v41 = vpack.c.bf16 %v1816_v40, %v1815_v37 }
 0x945   : > { %1959 = vmatmul.mubr.bf16.vlgmr.msra.gmra.mrb[36].mxu1 %v1817_v41 }
 0xa18   : > { %v1960_v62 = vpop.f32.mrb[36].mxu1 }
 0xa19   : > { %v1961_v63 = vadd.f32 %v1960_v62, %v1839_v60  ;;  %v1962_v0 = vpop.f32.mrb[37].mxu1 }
 0xa1a   : > { %v1963_v1 = vadd.f32 %v1962_v0, %v1843_v61  ;;  %v1964_v19 = vpop.f32.mrb[38].mxu1 }
 0xa1b   : > { %v1973_v2 = vmul.f32 0.044715, %v1961_v63  ;;  %v1965_v3 = vadd.f32 %v1964_v19, %v1839_v60  ;;  %v1966_v38 = vpop.f32.mrb[39].mxu1  ;;  %v1969_v28 = vmul.f32 0.5, %v1961_v63 }
 0xa1c   : > { %v1974_v4 = vmul.f32 0.044715, %v1963_v1  ;;  %v1967_v5 = vadd.f32 %v1966_v38, %v1843_v61  ;;  %v1970_v30 = vmul.f32 0.5, %v1963_v1 }
 0xa1d   : > { %v1977_v6 = vmul.f32 %v1973_v2, %v1961_v63  ;;  %v1975_v7 = vmul.f32 0.044715, %v1965_v3  ;;  %v1971_v29 = vmul.f32 0.5, %v1965_v3 }
 0xa1e   : > { %v1978_v8 = vmul.f32 %v1974_v4, %v1963_v1  ;;  %v1976_v9 = vmul.f32 0.044715, %v1967_v5  ;;  %v1972_v31 = vmul.f32 0.5, %v1967_v5 }
 0xa1f   : > { %v1981_v10 = vmul.f32 %v1977_v6, %v1961_v63  ;;  %v1979_v11 = vmul.f32 %v1975_v7, %v1965_v3 }
 0xa20   : > { %v1982_v54 = vmul.f32 %v1978_v8, %v1963_v1  ;;  %v1980_v12 = vmul.f32 %v1976_v9, %v1967_v5 }
 0xa21   : > { %v1985_v53 = vadd.f32 %v1981_v10, %v1961_v63  ;;  %v1983_v59 = vmul.f32 %v1979_v11, %v1965_v3 }
 0xa22   : > { %v1984_v13 = vmul.f32 %v1980_v12, %v1967_v5  ;;  %v1986_v14 = vadd.f32 %v1982_v54, %v1963_v1 }
 0xa23   : > { %v1989_v15 = vmul.f32 0.7978846, %v1985_v53  ;;  %v1987_v16 = vadd.f32 %v1983_v59, %v1965_v3 }
 0xa24   : > { %v1988_v17 = vadd.f32 %v1984_v13, %v1967_v5  ;;  %v1990_v18 = vmul.f32 0.7978846, %v1986_v14 }
 0xa25   : > { %3035 = vtanh.f32 %v1989_v15  ;;  %v1991_v20 = vmul.f32 0.7978846, %v1987_v16 }
 0xa26   : > { %v1992_v21 = vmul.f32 0.7978846, %v1988_v17  ;;  %3037 = vtanh.f32 %v1990_v18 }
 0xa27   : > { %3039 = vtanh.f32 %v1991_v20 }
 0xa28   : > { %3041 = vtanh.f32 %v1992_v21 }
 0xa2f   : > { %v3036_v22 = vpop.eup %3035 }
 0xa30   : > { %v3038_v23 = vpop.eup %3037  ;;  %v1997_v24 = vadd.f32 1.0, %v3036_v22 }
 0xa31   : > { %v3040_v25 = vpop.eup %3039  ;;  %v1998_v26 = vadd.f32 1.0, %v3038_v23 }
 0xa32   : > { %v3042_v27 = vpop.eup %3041  ;;  %v1999_v44 = vadd.f32 1.0, %v3040_v25  ;;  %v2001_v37 = vmul.f32 %v1997_v24, %v1969_v28 }
 0xa33   : > { %v2000_v32 = vadd.f32 1.0, %v3042_v27  ;;  %v2002_v41 = vmul.f32 %v1998_v26, %v1970_v30 }
 0xa34   : > { %v2003_v40 = vmul.f32 %v1999_v44, %v1971_v29 }
 0xa35   : > { %v2004_v33 = vmul.f32 %v2000_v32, %v1972_v31 }
 0xa36   : > { %v2005_v34 = vpack.c.bf16 %v2003_v40, %v2001_v37 }
 0xa37   : > { %v2006_v35 = vpack.c.bf16 %v2004_v33, %v2002_v41 }
 0xa39   : > { %2174 = vmatprep.mubr.bf16.mxu0 %v2006_v35 }
 0xa3a   : > { %2175 = vmatmul.mubr.bf16.vlgmr.msra.gmra.mrb[12].mxu0 %v2005_v34 }
 0xb0d   : > { %v2631_v36 = vpop.f32.mrb[12].mxu0 }
 0xb0e   : > { %v2632_v42 = vpop.f32.mrb[13].mxu0 }
 0xb0f   : > { %v2633_v46 = vadd.f32 %v2632_v42, %v2631_v36  ;;  %v2634_v47 = vpop.f32.mrb[14].mxu0 }
 0xb10   : > { %v2635_v48 = vpop.f32.mrb[15].mxu0 }
 0xb11   : > { %v2177_v49 = vadd.f32 %v2633_v46, %v2548_v55  ;;  %v2636_v50 = vadd.f32 %v2635_v48, %v2634_v47  ;;  %2190 = sbr.rel (%p2565_p0) target bundleno = 2840 (0xb18), region = 88 }
 0xb13   : > { %v2183_v51 = vadd.f32 %v2177_v49, %v4065_v58  ;;  %v2180_v52 = vadd.f32 %v2636_v50, %v2548_v55 }
 0xb15   : > { %2185 = vst [vmem:[#allocation2] sm:$0xff] %v2183_v51  ;;  %v2184_v56 = vadd.f32 %v2180_v52, %v4068_v43  ;;  %2191 = vst [vmem:[%s3872_s29] sm:$0xff] (!%p2565_p0), %v2183_v51 }
 0xb17   : > { %2186 = vst [vmem:[#allocation2 + $0x8] sm:$0xff] %v2184_v56  ;;  %2192 = vst [vmem:[%s3872_s29 + $0x8] sm:$0xff] (!%p2565_p0), %v2184_v56 }
 0xb18 PF: > { %s4292_s3 = sld [smem:[#allocation23_spill]]  ;;  %s4293_s23 = sld [smem:[#allocation41_spill]] }
 0xb19   : > { %s2207_s1 = sshll.u32 %s3872_s29, 4  ;;  %s2194_s8 = scalar_lea.sflag [#allocation5], %s3816_s14  ;;  %s4131_s1 = int_to_ptr.vmem [resolvable:$true] %s2207_s1 }
 0xb1a   : > { %s3225_s5 = scalar_lea.vmem %s4131_s1, 256  ;;  %p4294_p13 = scmp.ne.s32.totalorder %s4265_s21, 0 }
 0xb1b   : > { %p3226_p9 = scmp.ne.s32.totalorder %s4131_s1, %s3225_s5  ;;  %s3377_s25 = smov [#allocation14]  }
 0xb1c   : > { %s3229_s20 = sshll.u32 %s3377_s25, 4  ;;  %s3230_s20 = int_to_ptr.vmem [resolvable:$false] %s3229_s20 }
 0xb1d   : > { %p3227_p10 = pnand %p3226_p9, %p4294_p13  ;;  %s3231_s24 = scalar_lea.vmem %s3230_s20, 512 }
 0xb1e   : > { %s2576_s18 = sshll.u32 %s4292_s3, 8  ;;  %p3232_p1 = scmp.lt.s32.totalorder %s4131_s1, %s3230_s20 }
 0xb1f   : > { %s4128_s7 = scalar_lea.hbm %s4293_s23, %s2576_s18  ;;  %p3228_p6 = pneg %p3227_p10 }
 0xb20   : > { %p3233_p2 = scmp.lt.s32.totalorder %s3231_s24, %s3225_s5 }
 0xb22   : > { %p3234_p4 = por %p3233_p2, %p3232_p1 }
 0xb24   : > { %p3235_p12 = pnand %p3234_p4, %p3228_p6 }
 0xb26   : > { %3238 = shalt.err (!%p3235_p12)
}
 0xb27   : > { %s3239_s29 = scalar_lea.hbm %s4128_s7, 256  ;;  %s3243_s0 = scalar_lea.hbm %s4293_s23, 512 }
 0xb28   : > { %p3240_p8 = scmp.ne.s32.totalorder %s4128_s7, %s3239_s29  ;;  %p3244_p11 = scmp.lt.u32.totalorder %s4128_s7, %s4293_s23 }
 0xb29   : > { %p3245_p5 = scmp.lt.u32.totalorder %s3243_s0, %s3239_s29  ;;  %p3247_p9 = scmp.lt.u32.totalorder %s3239_s29, %s4128_s7 }
 0xb2a   : > { %p3241_p3 = pnand %p3240_p8, %p4294_p13 }
 0xb2b   : > { %p3246_p0 = por %p3245_p5, %p3244_p11 }
 0xb2c   : > { %p3242_p7 = pneg %p3241_p3 }
 0xb2d   : > { %p3248_p10 = por %p3247_p9, %p3246_p0 }
 0xb2f   : > { %p3249_p6 = pnand %p3248_p10, %p3242_p7 }
 0xb31   : > { %3252 = shalt.err (!%p3249_p6)
}
 0xb32   : > { %s3378_s22 = smov 128   ;;  %s3379_s10 = smov 8  }
 0xb33   : > { %2700 = dma.vmem_to_hbm [thread:$0]  (%p4294_p13), %s4131_s1, 256, %s4128_s7, %s2194_s8, %s3378_s22, %s3378_s22, %s3379_s10  }
 0xb34 PF: > { %p2726_p1 = scmp.ge.s32.totalorder %s3359_s19, 2  ;;  %s2222_s4 = sand.u32 1, %s3331_s12  }
 0xb35   : > { %p4295_p2 = scmp.ne.s32.totalorder %s4266_s30, 0  ;;  %s2223_s28 = scalar_lea.sflag [#allocation5], %s2222_s4 }
 0xb37   : > { %p2722_p4 = pnand %p2726_p1, %p4295_p2 }
 0xb39   : > { %3314 = dma.done.wait (!%p2722_p4), %s2223_s28, 256  }
 0xb3a   : > { %3316 = vsyncadd (!%p2722_p4), %s2223_s28, 4294967040  ;;  %s34_s19 = sadd.s32 1, %s3359_s19   ;;  %s4296_s30 = sld [smem:[#allocation20_spill]] }
 0xb3b   : > { %p31_p12 = scmp.ge.s32.totalorder %s34_s19, 6   ;;  %s4297_s9 = sld [smem:[#allocation30_spill]] }
 0xb3c   : > { %s4298_s21 = sld [smem:[#allocation21_spill]]  ;;  %s4299_s14 = sld [smem:[#allocation31_spill]] }
 0xb3d   : > { %s4300_s16 = sld [smem:[#allocation24_spill]]  ;;  %s4301_s3 = sld [smem:[#allocation27_spill]] }
 0xb3e   : > { %s4302_s18 = sld [smem:[#allocation28_spill]]  ;;  %s4303_s10 = smov %s3327_s11 }
 0xb3f   : > { %s4305_s12 = smov %s3335_s13  ;;  %s4307_s15 = smov %s3351_s17 }
 0xb40   :  { %33 = sbr.rel (!%p31_p12) target bundleno = 26 (0x1a), region = 179 }
 0xb41   : > { %s4304_s11 = smov %s4297_s9 }
 0xb42   : > { %s4306_s13 = smov %s4298_s21 }
 0xb43   : > { %s4308_s17 = smov %s4301_s3 }
 0xb47   :  { %2228 = vsyncpa [#allocation4], 1 }
 0xb48   :  { %2230 = vsyncpa [#allocation4 + $0x1], 1 }
 0xb49   :  { %2231 = vsyncpa [#allocation7], 1 }
 0xb4a   :  { %2233 = vsyncpa [#allocation7 + $0x1], 1 }
 0xb4b   :  { %2234 = vsyncpa [#allocation10], 1 }
 0xb4c   :  { %2236 = vsyncpa [#allocation10 + $0x1], 1 }
 0xb4d   :  { %2237 = vsyncpa [#allocation13], 1 }
 0xb4e   :  { %2239 = vsyncpa [#allocation13 + $0x1], 1 }
 0xb4f   :  { %2240 = vsyncpa [#allocation5], 1 }
 0xb50   :  { %2242 = vsyncpa [#allocation5 + $0x1], 1 }

</bundles_post_ra>
